<compile_context>
chip_gen: v7x
topology: tpu7x:2x2x1
jax: 0.10.0
libtpu: 0.0.40
codegen_flags: <defaults>
</compile_context>

<pallas_src>
import functools

import jax
import jax.numpy as jnp
from jax.experimental import pallas as pl
from jax.experimental.pallas import tpu as pltpu


def _elu(x):
    # ELU(alpha=1): x if x > 0 else exp(x) - 1   (exp on clamped arg to avoid overflow)
    return jnp.where(x > 0, x, jnp.exp(jnp.minimum(x, 0.0)) - 1.0)


# ----------------------------------------------------------------------------
# Fused kernel: conv1(+BN+ELU) -> conv2a(+BN+ELU) -> conv2b(+BN) -> SE -> add -> ELU
# One grid step == one batch element; everything stays in VMEM, lane-dense (H, W*C).
# ----------------------------------------------------------------------------
def fused_block_kernel(x_ref, w1_ref, w2a_ref, w2b_ref, shift_ref,
                       fc1_ref, fc1b_ref, fc2_ref, fc2b_ref,
                       o_ref,
                       xpad1, xpad2,
                       *, H, W, cout, compute_dtype):

    def conv3x3(xpad, w_ref, shift):
        # 3 accumulating MXU matmuls (one per kernel row dy).  The horizontal taps and the
        # horizontal zero padding live in the banded (W*Cin, W*Cout) weight slabs; the BN
        # scale is pre-folded into the weights, only the additive shift remains.
        y = shift                                                   # (1, W*cout) f32
        for dy in range(3):
            lhs = xpad[dy:dy + H, :]                                # (H, W*cin) slab rows
            if compute_dtype != jnp.float32:
                lhs = lhs.astype(compute_dtype)
            y = y + jnp.dot(lhs, w_ref[dy], preferred_element_type=jnp.float32)
        return y                                                    # (H, W*cout) f32

    # Zero only the 1-row top/bottom halo; interiors are fully rewritten below.  Re-zeroed
    # every step (cheap) so it is correct under megacore "parallel" grid sharding.
    z1 = jnp.zeros((1, xpad1.shape[1]), xpad1.dtype)
    z2 = jnp.zeros((1, xpad2.shape[1]), xpad2.dtype)
    xpad1[0:1, :] = z1
    xpad1[H + 1:H + 2, :] = z1
    xpad2[0:1, :] = z2
    xpad2[H + 1:H + 2, :] = z2

    shifts = shift_ref[...]                                         # (3, W*cout) f32

    # block1: conv + (folded) BN + ELU  -> residual (kept live, lane-dense, tiny)
    xpad1[1:H + 1, :] = x_ref[0]
    res = _elu(conv3x3(xpad1, w1_ref, shifts[0:1, :]))              # (H, W*cout)

    # block2: conv + BN + ELU, conv + BN
    xpad2[1:H + 1, :] = res
    h2a = _elu(conv3x3(xpad2, w2a_ref, shifts[1:2, :]))
    xpad2[1:H + 1, :] = h2a
    b2 = conv3x3(xpad2, w2b_ref, shifts[2:3, :])                    # (H, W*cout)

    # SE on the residual: pool-over-W and 1/(H*W) are folded into the expanded FC1 weight;
    # FC2 and its bias are expanded to (., W*cout) so the sigmoid gate is lane-dense.
    rowsum = jnp.sum(res, axis=0, keepdims=True)                    # (1, W*cout)
    g = jnp.dot(rowsum, fc1_ref[...], preferred_element_type=jnp.float32) + fc1b_ref[...]
    g = jnp.maximum(g, 0.0)                                         # ReLU, (1, hid)
    g = jnp.dot(g, fc2_ref[...], preferred_element_type=jnp.float32) + fc2b_ref[...]
    gate = jax.nn.sigmoid(g)                                        # (1, W*cout)

    # out = ELU(se(residual) + block2(residual)); lane-dense unmasked store
    o_ref[...] = _elu(res * gate + b2).reshape(1, H, W * cout)


# ----------------------------------------------------------------------------
# Host-side parameter preparation (banded conv weights, BN folding, lane-dense SE params)
# ----------------------------------------------------------------------------
def _banded_conv_weight(w_oihw, scale, W, dtype):
    """(Cout, Cin, 3, 3) OIHW -> (3, W*Cin, W*Cout) banded slabs with BN scale folded in.

    band[dy][wp*Cin+ci, w*Cout+co] = w[co,ci,dy,dx]*scale[co]  where wp = w+dx-1 in [0, W).
    Out-of-range wp entries simply do not exist == horizontal zero padding.
    """
    cout, cin = w_oihw.shape[0], w_oihw.shape[1]
    w = jnp.transpose(w_oihw, (2, 3, 1, 0)) * scale.reshape(1, 1, 1, cout)  # (3,3,Cin,Cout)
    bands = []
    for dy in range(3):
        m = jnp.zeros((W * cin, W * cout), jnp.float32)
        for dx in range(3):
            m = m + jnp.kron(jnp.eye(W, k=1 - dx, dtype=jnp.float32), w[dy, dx])
        bands.append(m)
    return jnp.stack(bands).astype(dtype)                            # (3, W*Cin, W*Cout)


def prepare_lane_dense_params(p, H, W, compute_dtype=jnp.float32):
    cout = p['w1_oihw'].shape[0]
    hid = p['fc1_w'].shape[0]

    def dense_c(v):  # (cout,) -> (1, W*cout) with [0, w*cout+c] = v[c]
        return jnp.tile(v.reshape(1, cout), (1, W)).astype(jnp.float32)

    shifts = jnp.concatenate([dense_c(p['t1']), dense_c(p['t2a']), dense_c(p['t2b'])], axis=0)
    return dict(
        w1=_banded_conv_weight(p['w1_oihw'], p['s1'], W, compute_dtype),
        w2a=_banded_conv_weight(p['w2a_oihw'], p['s2a'], W, compute_dtype),
        w2b=_banded_conv_weight(p['w2b_oihw'], p['s2b'], W, compute_dtype),
        shift=shifts,                                                # (3, W*cout)
        fc1=(jnp.tile(p['fc1_w'].T, (W, 1)) / float(H * W)).astype(jnp.float32),  # (W*cout, hid)
        fc1_b=p['fc1_b'].reshape(1, hid).astype(jnp.float32),
        fc2=jnp.tile(p['fc2_w'].T, (1, W)).astype(jnp.float32),      # (hid, W*cout)
        fc2_b=dense_c(p['fc2_b']),                                   # (1, W*cout)
    )


def _derived_vmem_limit(H, W, cin, cout, hid, compute_dtype):
    def padded_bytes(r, c, itemsize=4):
        return -(-r // 8) * 8 * -(-c // 128) * 128 * itemsize
    wib = jnp.dtype(compute_dtype).itemsize
    scratch = padded_bytes(H + 2, W * cin) + padded_bytes(H + 2, W * cout)
    io = 2 * (padded_bytes(H, W * cin) + padded_bytes(H, W * cout))          # double-buffered
    weights = 2 * (padded_bytes(3 * W * cin, W * cout, wib)
                   + 2 * padded_bytes(3 * W * cout, W * cout, wib))
    small = 2 * (padded_bytes(3, W * cout) + padded_bytes(W * cout, hid)
                 + padded_bytes(hid, W * cout) + 2 * padded_bytes(1, W * cout))
    need = scratch + io + weights + small
    # 2x margin, clamp to [16 MiB, 48 MiB] (48 MiB keeps headroom on v7x's 64 MiB VMEM)
    return int(min(max(2 * need, 16 * 2 ** 20), 48 * 2 ** 20))


# ----------------------------------------------------------------------------
# Wrappers
# ----------------------------------------------------------------------------
def res_unet_aniso_block_nhwc(x_nhwc, prepped, *, compute_dtype=jnp.float32):
    N, H, W, Cin = x_nhwc.shape
    WCout = prepped['shift'].shape[1]
    Cout = WCout // W
    hid = prepped['fc1'].shape[1]

    x2d = x_nhwc.reshape(N, H, W * Cin)          # lane-dense input view (contiguous, free)

    kernel = functools.partial(fused_block_kernel, H=H, W=W, cout=Cout,
                               compute_dtype=compute_dtype)

    out2d = pl.pallas_call(
        kernel,
        out_shape=jax.ShapeDtypeStruct((N, H, W * Cout), jnp.float32),
        grid=(N,),
        in_specs=[
            pl.BlockSpec((1, H, W * Cin), lambda n: (n, 0, 0)),           # x (lane-dense)
            pl.BlockSpec((3, W * Cin, W * Cout), lambda n: (0, 0, 0)),    # banded w1
            pl.BlockSpec((3, W * Cout, W * Cout), lambda n: (0, 0, 0)),   # banded w2a
            pl.BlockSpec((3, W * Cout, W * Cout), lambda n: (0, 0, 0)),   # banded w2b
            pl.BlockSpec((3, W * Cout), lambda n: (0, 0)),                # BN shifts (dense)
            pl.BlockSpec((W * Cout, hid), lambda n: (0, 0)),              # FC1 (pool folded)
            pl.BlockSpec((1, hid), lambda n: (0, 0)),                     # FC1 bias
            pl.BlockSpec((hid, W * Cout), lambda n: (0, 0)),              # FC2 (lane-dense)
            pl.BlockSpec((1, W * Cout), lambda n: (0, 0)),                # FC2 bias (dense)
        ],
        out_specs=pl.BlockSpec((1, H, W * Cout), lambda n: (n, 0, 0)),
        scratch_shapes=[
            pltpu.VMEM((H + 2, W * Cin), jnp.float32),    # vertically-padded conv1 input
            pltpu.VMEM((H + 2, W * Cout), jnp.float32),   # vertically-padded conv2a/2b input
        ],
        compiler_params=pltpu.CompilerParams(
            dimension_semantics=("parallel",),
            vmem_limit_bytes=_derived_vmem_limit(H, W, Cin, Cout, hid, compute_dtype),
        ),
    )(x2d, prepped['w1'], prepped['w2a'], prepped['w2b'], prepped['shift'],
      prepped['fc1'], prepped['fc1_b'], prepped['fc2'], prepped['fc2_b'])

    return out2d.reshape(N, H, W, Cout)


def res_unet_aniso_block(x_nchw, raw_params, *, compute_dtype=jnp.float32):
    # NCHW boundary to match the PyTorch module; embed res_unet_aniso_block_nhwc directly in
    # a larger NHWC model to avoid the per-block transposes.
    x = jnp.transpose(x_nchw, (0, 2, 3, 1))                           # NCHW -> NHWC
    _, H, W, _ = x.shape
    prepped = prepare_lane_dense_params(raw_params, H, W, compute_dtype)
    out = res_unet_aniso_block_nhwc(x, prepped, compute_dtype=compute_dtype)
    return jnp.transpose(out, (0, 3, 1, 2))                           # NHWC -> NCHW


# ----------------------------------------------------------------------------
# Parameter setup (deterministic, shapes match the PyTorch module __init__)
# ----------------------------------------------------------------------------
def make_params(key, in_planes, out_planes, reduction=4):
    ks = jax.random.split(key, 10)
    hid = out_planes // reduction
    eps = 1e-5

    def bn_fold(k):   # inference-mode BN folded to per-channel (scale, shift)
        k1, k2, k3, k4 = jax.random.split(k, 4)
        gamma = 1.0 + 0.1 * jax.random.normal(k1, (out_planes,), jnp.float32)
        beta = 0.05 * jax.random.normal(k2, (out_planes,), jnp.float32)
        rmean = 0.1 * jax.random.normal(k3, (out_planes,), jnp.float32)
        rvar = 1.0 + 0.1 * jax.random.uniform(k4, (out_planes,), jnp.float32)
        scale = gamma / jnp.sqrt(rvar + eps)
        shift = beta - rmean * scale
        return scale, shift

    def conv_w(k, cin):
        return 0.1 * jax.random.normal(k, (out_planes, cin, 3, 3), jnp.float32)  # OIHW

    s1, t1 = bn_fold(ks[3])
    s2a, t2a = bn_fold(ks[4])
    s2b, t2b = bn_fold(ks[5])
    return dict(
        w1_oihw=conv_w(ks[0], in_planes),
        w2a_oihw=conv_w(ks[1], out_planes),
        w2b_oihw=conv_w(ks[2], out_planes),
        s1=s1, t1=t1, s2a=s2a, t2a=t2a, s2b=s2b, t2b=t2b,
        fc1_w=0.2 * jax.random.normal(ks[6], (hid, out_planes), jnp.float32),  # torch (out,in)
        fc1_b=0.05 * jax.random.normal(ks[7], (hid,), jnp.float32),
        fc2_w=0.2 * jax.random.normal(ks[8], (out_planes, hid), jnp.float32),
        fc2_b=0.05 * jax.random.normal(ks[9], (out_planes,), jnp.float32),
    )


# ----------------------------------------------------------------------------
# Pure-JAX reference (same math) for a correctness check
# ----------------------------------------------------------------------------
def ref_forward(x_nchw, p):
    x = jnp.transpose(x_nchw, (0, 2, 3, 1))

    def conv(x, w_oihw):
        w = jnp.transpose(w_oihw, (2, 3, 1, 0))  # HWIO
        return jax.lax.conv_general_dilated(
            x, w, (1, 1), 'SAME', dimension_numbers=('NHWC', 'HWIO', 'NHWC'))

    def bn(x, s, t):
        return x * s.reshape(1, 1, 1, -1) + t.reshape(1, 1, 1, -1)

    residual = _elu(bn(conv(x, p['w1_oihw']), p['s1'], p['t1']))
    b2 = _elu(bn(conv(residual, p['w2a_oihw']), p['s2a'], p['t2a']))
    b2 = bn(conv(b2, p['w2b_oihw']), p['s2b'], p['t2b'])
    pooled = jnp.mean(residual, axis=(1, 2))                                   # (N, C)
    h = jnp.maximum(pooled @ p['fc1_w'].T + p['fc1_b'], 0.0)
    y = jax.nn.sigmoid(h @ p['fc2_w'].T + p['fc2_b'])                          # (N, C)
    out = _elu(residual * y[:, None, None, :] + b2)
    return jnp.transpose(out, (0, 3, 1, 2))


if __name__ == "__main__":
    N, Cin, Cout, H, W = 2, 4, 8, 16, 16
    key = jax.random.PRNGKey(0)
    kx, kp = jax.random.split(key)
    x = jax.random.normal(kx, (N, Cin, H, W), jnp.float32)
    params = make_params(kp, Cin, Cout)

    ref = jax.block_until_ready(ref_forward(x, params))

    # f32 path
    out = jax.block_until_ready(res_unet_aniso_block(x, params))
    assert out.shape == (N, Cout, H, W), out.shape
    assert jnp.allclose(out, ref, rtol=2e-4, atol=2e-4), float(jnp.max(jnp.abs(out - ref)))

    # bf16 MXU-operand path (v6e/v7x), looser tolerance
    out_bf16 = jax.block_until_ready(
        res_unet_aniso_block(x, params, compute_dtype=jnp.bfloat16))
    assert out_bf16.shape == (N, Cout, H, W), out_bf16.shape
    assert jnp.allclose(out_bf16, ref, rtol=1e-1, atol=1e-1), \
        float(jnp.max(jnp.abs(out_bf16 - ref)))

    print("KERNEL_OK")
</pallas_src>

<mosaic_0001>
module attributes {stable_mosaic.version = 11 : i64} {
  func.func @fused_block_kernel(%arg0: i32, %arg1: memref<1x16x64xf32, #tpu.memory_space<vmem>>, %arg2: memref<3x64x128xf32, #tpu.memory_space<vmem>>, %arg3: memref<3x128x128xf32, #tpu.memory_space<vmem>>, %arg4: memref<3x128x128xf32, #tpu.memory_space<vmem>>, %arg5: memref<3x128xf32, #tpu.memory_space<vmem>>, %arg6: memref<128x2xf32, #tpu.memory_space<vmem>>, %arg7: memref<1x2xf32, #tpu.memory_space<vmem>>, %arg8: memref<2x128xf32, #tpu.memory_space<vmem>>, %arg9: memref<1x128xf32, #tpu.memory_space<vmem>>, %arg10: memref<1x16x128xf32, #tpu.memory_space<vmem>>, %arg11: memref<18x64xf32, #tpu.memory_space<vmem>>, %arg12: memref<18x128xf32, #tpu.memory_space<vmem>>) attributes {dimension_semantics = [#tpu.dimension_semantics<parallel>], iteration_bounds = array<i64: 2>, scalar_prefetch = 0 : i64, scratch_operands = 2 : i64, tpu.core_type = #tpu.core_type<tc>, window_params = [{transform_indices = @transform_0, window_bounds = array<i64: 1, 16, 64>}, {pipeline_mode = #tpu.pipeline_mode<synchronous>, transform_indices = @transform_1, window_bounds = array<i64: 3, 64, 128>}, {pipeline_mode = #tpu.pipeline_mode<synchronous>, transform_indices = @transform_2, window_bounds = array<i64: 3, 128, 128>}, {pipeline_mode = #tpu.pipeline_mode<synchronous>, transform_indices = @transform_3, window_bounds = array<i64: 3, 128, 128>}, {pipeline_mode = #tpu.pipeline_mode<synchronous>, transform_indices = @transform_4, window_bounds = array<i64: 3, 128>}, {pipeline_mode = #tpu.pipeline_mode<synchronous>, transform_indices = @transform_5, window_bounds = array<i64: 128, 2>}, {pipeline_mode = #tpu.pipeline_mode<synchronous>, transform_indices = @transform_6, window_bounds = array<i64: 1, 2>}, {pipeline_mode = #tpu.pipeline_mode<synchronous>, transform_indices = @transform_7, window_bounds = array<i64: 2, 128>}, {pipeline_mode = #tpu.pipeline_mode<synchronous>, transform_indices = @transform_8, window_bounds = array<i64: 1, 128>}, {transform_indices = @transform_9, window_bounds = array<i64: 1, 16, 128>}]} {
    %cst = arith.constant 0.000000e+00 : f32
    %0 = vector.broadcast %cst : f32 to vector<1x64xf32>
    %cst_0 = arith.constant 0.000000e+00 : f32
    %1 = vector.broadcast %cst_0 : f32 to vector<1x128xf32>
    %c0 = arith.constant 0 : index
    %c0_1 = arith.constant 0 : index
    %2 = vector.load %arg11[%c0, %c0_1] : memref<18x64xf32, #tpu.memory_space<vmem>>, vector<1x64xf32>
    tpu.vector_store %arg11[%c0, %c0_1], %0 {strides = array<i32>} : memref<18x64xf32, #tpu.memory_space<vmem>>, vector<1x64xf32>,
    %c17 = arith.constant 17 : index
    %c0_2 = arith.constant 0 : index
    %3 = vector.load %arg11[%c17, %c0_2] : memref<18x64xf32, #tpu.memory_space<vmem>>, vector<1x64xf32>
    tpu.vector_store %arg11[%c17, %c0_2], %0 {strides = array<i32>} : memref<18x64xf32, #tpu.memory_space<vmem>>, vector<1x64xf32>,
    %c0_3 = arith.constant 0 : index
    %c0_4 = arith.constant 0 : index
    %4 = vector.load %arg12[%c0_3, %c0_4] : memref<18x128xf32, #tpu.memory_space<vmem>>, vector<1x128xf32>
    tpu.vector_store %arg12[%c0_3, %c0_4], %1 {strides = array<i32>} : memref<18x128xf32, #tpu.memory_space<vmem>>, vector<1x128xf32>,
    %c17_5 = arith.constant 17 : index
    %c0_6 = arith.constant 0 : index
    %5 = vector.load %arg12[%c17_5, %c0_6] : memref<18x128xf32, #tpu.memory_space<vmem>>, vector<1x128xf32>
    tpu.vector_store %arg12[%c17_5, %c0_6], %1 {strides = array<i32>} : memref<18x128xf32, #tpu.memory_space<vmem>>, vector<1x128xf32>,
    %c0_7 = arith.constant 0 : index
    %c0_8 = arith.constant 0 : index
    %6 = vector.load %arg5[%c0_7, %c0_8] : memref<3x128xf32, #tpu.memory_space<vmem>>, vector<3x128xf32>
    %c0_9 = arith.constant 0 : index
    %c0_10 = arith.constant 0 : index
    %c0_11 = arith.constant 0 : index
    %7 = vector.load %arg1[%c0_9, %c0_10, %c0_11] : memref<1x16x64xf32, #tpu.memory_space<vmem>>, vector<1x16x64xf32>
    %8 = vector.shape_cast %7 : vector<1x16x64xf32> to vector<16x64xf32>
    %c1 = arith.constant 1 : index
    %c0_12 = arith.constant 0 : index
    %9 = vector.load %arg11[%c1, %c0_12] : memref<18x64xf32, #tpu.memory_space<vmem>>, vector<16x64xf32>
    tpu.vector_store %arg11[%c1, %c0_12], %8 {strides = array<i32>} : memref<18x64xf32, #tpu.memory_space<vmem>>, vector<16x64xf32>,
    %10 = vector.extract_strided_slice %6 {offsets = [0, 0], sizes = [1, 128], strides = [1, 1]} : vector<3x128xf32> to vector<1x128xf32>
    %c0_13 = arith.constant 0 : index
    %c0_14 = arith.constant 0 : index
    %11 = vector.load %arg11[%c0_13, %c0_14] : memref<18x64xf32, #tpu.memory_space<vmem>>, vector<16x64xf32>
    %c0_15 = arith.constant 0 : index
    %c0_16 = arith.constant 0 : index
    %c0_17 = arith.constant 0 : index
    %12 = vector.load %arg2[%c0_15, %c0_16, %c0_17] : memref<3x64x128xf32, #tpu.memory_space<vmem>>, vector<1x64x128xf32>
    %13 = vector.shape_cast %12 : vector<1x64x128xf32> to vector<64x128xf32>
    %cst_18 = arith.constant dense<0.000000e+00> : vector<16x128xf32>
    %14 = tpu.matmul %11, %13, %cst_18 {dimension_numbers = #tpu.dot_dimension_numbers<[1], [0], [0], [1], [0, 0, 1, 1], [], []>} : vector<16x64xf32>, vector<64x128xf32>, vector<16x128xf32> -> vector<16x128xf32>
    %15 = vector.broadcast %10 : vector<1x128xf32> to vector<16x128xf32>
    %16 = arith.addf %15, %14 : vector<16x128xf32>
    %c1_19 = arith.constant 1 : index
    %c0_20 = arith.constant 0 : index
    %17 = vector.load %arg11[%c1_19, %c0_20] : memref<18x64xf32, #tpu.memory_space<vmem>>, vector<16x64xf32>
    %c1_21 = arith.constant 1 : index
    %c0_22 = arith.constant 0 : index
    %c0_23 = arith.constant 0 : index
    %18 = vector.load %arg2[%c1_21, %c0_22, %c0_23] : memref<3x64x128xf32, #tpu.memory_space<vmem>>, vector<1x64x128xf32>
    %19 = vector.shape_cast %18 : vector<1x64x128xf32> to vector<64x128xf32>
    %cst_24 = arith.constant dense<0.000000e+00> : vector<16x128xf32>
    %20 = tpu.matmul %17, %19, %cst_24 {dimension_numbers = #tpu.dot_dimension_numbers<[1], [0], [0], [1], [0, 0, 1, 1], [], []>} : vector<16x64xf32>, vector<64x128xf32>, vector<16x128xf32> -> vector<16x128xf32>
    %21 = arith.addf %16, %20 : vector<16x128xf32>
    %c2 = arith.constant 2 : index
    %c0_25 = arith.constant 0 : index
    %22 = vector.load %arg11[%c2, %c0_25] : memref<18x64xf32, #tpu.memory_space<vmem>>, vector<16x64xf32>
    %c2_26 = arith.constant 2 : index
    %c0_27 = arith.constant 0 : index
    %c0_28 = arith.constant 0 : index
    %23 = vector.load %arg2[%c2_26, %c0_27, %c0_28] : memref<3x64x128xf32, #tpu.memory_space<vmem>>, vector<1x64x128xf32>
    %24 = vector.shape_cast %23 : vector<1x64x128xf32> to vector<64x128xf32>
    %cst_29 = arith.constant dense<0.000000e+00> : vector<16x128xf32>
    %25 = tpu.matmul %22, %24, %cst_29 {dimension_numbers = #tpu.dot_dimension_numbers<[1], [0], [0], [1], [0, 0, 1, 1], [], []>} : vector<16x64xf32>, vector<64x128xf32>, vector<16x128xf32> -> vector<16x128xf32>
    %26 = arith.addf %21, %25 : vector<16x128xf32>
    %cst_30 = arith.constant 0.000000e+00 : f32
    %27 = vector.broadcast %cst_30 : f32 to vector<16x128xf32>
    %28 = arith.cmpf ogt, %26, %27 : vector<16x128xf32>
    %cst_31 = arith.constant 0.000000e+00 : f32
    %29 = vector.broadcast %cst_31 : f32 to vector<16x128xf32>
    %30 = arith.minimumf %26, %29 : vector<16x128xf32>
    %31 = math.exp %30 : vector<16x128xf32>
    %cst_32 = arith.constant 1.000000e+00 : f32
    %32 = vector.broadcast %cst_32 : f32 to vector<16x128xf32>
    %33 = arith.subf %31, %32 : vector<16x128xf32>
    %34 = arith.select %28, %26, %33 : vector<16x128xi1>, vector<16x128xf32>
    %c1_33 = arith.constant 1 : index
    %c0_34 = arith.constant 0 : index
    %35 = vector.load %arg12[%c1_33, %c0_34] : memref<18x128xf32, #tpu.memory_space<vmem>>, vector<16x128xf32>
    tpu.vector_store %arg12[%c1_33, %c0_34], %34 {strides = array<i32>} : memref<18x128xf32, #tpu.memory_space<vmem>>, vector<16x128xf32>,
    %36 = vector.extract_strided_slice %6 {offsets = [1, 0], sizes = [1, 128], strides = [1, 1]} : vector<3x128xf32> to vector<1x128xf32>
    %c0_35 = arith.constant 0 : index
    %c0_36 = arith.constant 0 : index
    %37 = vector.load %arg12[%c0_35, %c0_36] : memref<18x128xf32, #tpu.memory_space<vmem>>, vector<16x128xf32>
    %c0_37 = arith.constant 0 : index
    %c0_38 = arith.constant 0 : index
    %c0_39 = arith.constant 0 : index
    %38 = vector.load %arg3[%c0_37, %c0_38, %c0_39] : memref<3x128x128xf32, #tpu.memory_space<vmem>>, vector<1x128x128xf32>
    %39 = vector.shape_cast %38 : vector<1x128x128xf32> to vector<128x128xf32>
    %cst_40 = arith.constant dense<0.000000e+00> : vector<16x128xf32>
    %40 = tpu.matmul %37, %39, %cst_40 {dimension_numbers = #tpu.dot_dimension_numbers<[1], [0], [0], [1], [0, 0, 1, 1], [], []>} : vector<16x128xf32>, vector<128x128xf32>, vector<16x128xf32> -> vector<16x128xf32>
    %41 = vector.broadcast %36 : vector<1x128xf32> to vector<16x128xf32>
    %42 = arith.addf %41, %40 : vector<16x128xf32>
    %c1_41 = arith.constant 1 : index
    %c0_42 = arith.constant 0 : index
    %43 = vector.load %arg12[%c1_41, %c0_42] : memref<18x128xf32, #tpu.memory_space<vmem>>, vector<16x128xf32>
    %c1_43 = arith.constant 1 : index
    %c0_44 = arith.constant 0 : index
    %c0_45 = arith.constant 0 : index
    %44 = vector.load %arg3[%c1_43, %c0_44, %c0_45] : memref<3x128x128xf32, #tpu.memory_space<vmem>>, vector<1x128x128xf32>
    %45 = vector.shape_cast %44 : vector<1x128x128xf32> to vector<128x128xf32>
    %cst_46 = arith.constant dense<0.000000e+00> : vector<16x128xf32>
    %46 = tpu.matmul %43, %45, %cst_46 {dimension_numbers = #tpu.dot_dimension_numbers<[1], [0], [0], [1], [0, 0, 1, 1], [], []>} : vector<16x128xf32>, vector<128x128xf32>, vector<16x128xf32> -> vector<16x128xf32>
    %47 = arith.addf %42, %46 : vector<16x128xf32>
    %c2_47 = arith.constant 2 : index
    %c0_48 = arith.constant 0 : index
    %48 = vector.load %arg12[%c2_47, %c0_48] : memref<18x128xf32, #tpu.memory_space<vmem>>, vector<16x128xf32>
    %c2_49 = arith.constant 2 : index
    %c0_50 = arith.constant 0 : index
    %c0_51 = arith.constant 0 : index
    %49 = vector.load %arg3[%c2_49, %c0_50, %c0_51] : memref<3x128x128xf32, #tpu.memory_space<vmem>>, vector<1x128x128xf32>
    %50 = vector.shape_cast %49 : vector<1x128x128xf32> to vector<128x128xf32>
    %cst_52 = arith.constant dense<0.000000e+00> : vector<16x128xf32>
    %51 = tpu.matmul %48, %50, %cst_52 {dimension_numbers = #tpu.dot_dimension_numbers<[1], [0], [0], [1], [0, 0, 1, 1], [], []>} : vector<16x128xf32>, vector<128x128xf32>, vector<16x128xf32> -> vector<16x128xf32>
    %52 = arith.addf %47, %51 : vector<16x128xf32>
    %cst_53 = arith.constant 0.000000e+00 : f32
    %53 = vector.broadcast %cst_53 : f32 to vector<16x128xf32>
    %54 = arith.cmpf ogt, %52, %53 : vector<16x128xf32>
    %cst_54 = arith.constant 0.000000e+00 : f32
    %55 = vector.broadcast %cst_54 : f32 to vector<16x128xf32>
    %56 = arith.minimumf %52, %55 : vector<16x128xf32>
    %57 = math.exp %56 : vector<16x128xf32>
    %cst_55 = arith.constant 1.000000e+00 : f32
    %58 = vector.broadcast %cst_55 : f32 to vector<16x128xf32>
    %59 = arith.subf %57, %58 : vector<16x128xf32>
    %60 = arith.select %54, %52, %59 : vector<16x128xi1>, vector<16x128xf32>
    %c1_56 = arith.constant 1 : index
    %c0_57 = arith.constant 0 : index
    %61 = vector.load %arg12[%c1_56, %c0_57] : memref<18x128xf32, #tpu.memory_space<vmem>>, vector<16x128xf32>
    tpu.vector_store %arg12[%c1_56, %c0_57], %60 {strides = array<i32>} : memref<18x128xf32, #tpu.memory_space<vmem>>, vector<16x128xf32>,
    %62 = vector.extract_strided_slice %6 {offsets = [2, 0], sizes = [1, 128], strides = [1, 1]} : vector<3x128xf32> to vector<1x128xf32>
    %c0_58 = arith.constant 0 : index
    %c0_59 = arith.constant 0 : index
    %63 = vector.load %arg12[%c0_58, %c0_59] : memref<18x128xf32, #tpu.memory_space<vmem>>, vector<16x128xf32>
    %c0_60 = arith.constant 0 : index
    %c0_61 = arith.constant 0 : index
    %c0_62 = arith.constant 0 : index
    %64 = vector.load %arg4[%c0_60, %c0_61, %c0_62] : memref<3x128x128xf32, #tpu.memory_space<vmem>>, vector<1x128x128xf32>
    %65 = vector.shape_cast %64 : vector<1x128x128xf32> to vector<128x128xf32>
    %cst_63 = arith.constant dense<0.000000e+00> : vector<16x128xf32>
    %66 = tpu.matmul %63, %65, %cst_63 {dimension_numbers = #tpu.dot_dimension_numbers<[1], [0], [0], [1], [0, 0, 1, 1], [], []>} : vector<16x128xf32>, vector<128x128xf32>, vector<16x128xf32> -> vector<16x128xf32>
    %67 = vector.broadcast %62 : vector<1x128xf32> to vector<16x128xf32>
    %68 = arith.addf %67, %66 : vector<16x128xf32>
    %c1_64 = arith.constant 1 : index
    %c0_65 = arith.constant 0 : index
    %69 = vector.load %arg12[%c1_64, %c0_65] : memref<18x128xf32, #tpu.memory_space<vmem>>, vector<16x128xf32>
    %c1_66 = arith.constant 1 : index
    %c0_67 = arith.constant 0 : index
    %c0_68 = arith.constant 0 : index
    %70 = vector.load %arg4[%c1_66, %c0_67, %c0_68] : memref<3x128x128xf32, #tpu.memory_space<vmem>>, vector<1x128x128xf32>
    %71 = vector.shape_cast %70 : vector<1x128x128xf32> to vector<128x128xf32>
    %cst_69 = arith.constant dense<0.000000e+00> : vector<16x128xf32>
    %72 = tpu.matmul %69, %71, %cst_69 {dimension_numbers = #tpu.dot_dimension_numbers<[1], [0], [0], [1], [0, 0, 1, 1], [], []>} : vector<16x128xf32>, vector<128x128xf32>, vector<16x128xf32> -> vector<16x128xf32>
    %73 = arith.addf %68, %72 : vector<16x128xf32>
    %c2_70 = arith.constant 2 : index
    %c0_71 = arith.constant 0 : index
    %74 = vector.load %arg12[%c2_70, %c0_71] : memref<18x128xf32, #tpu.memory_space<vmem>>, vector<16x128xf32>
    %c2_72 = arith.constant 2 : index
    %c0_73 = arith.constant 0 : index
    %c0_74 = arith.constant 0 : index
    %75 = vector.load %arg4[%c2_72, %c0_73, %c0_74] : memref<3x128x128xf32, #tpu.memory_space<vmem>>, vector<1x128x128xf32>
    %76 = vector.shape_cast %75 : vector<1x128x128xf32> to vector<128x128xf32>
    %cst_75 = arith.constant dense<0.000000e+00> : vector<16x128xf32>
    %77 = tpu.matmul %74, %76, %cst_75 {dimension_numbers = #tpu.dot_dimension_numbers<[1], [0], [0], [1], [0, 0, 1, 1], [], []>} : vector<16x128xf32>, vector<128x128xf32>, vector<16x128xf32> -> vector<16x128xf32>
    %78 = arith.addf %73, %77 : vector<16x128xf32>
    %cst_76 = arith.constant dense<0.000000e+00> : vector<128xf32>
    %79 = vector.multi_reduction <add>, %34, %cst_76 [0] : vector<16x128xf32> to vector<128xf32>
    %80 = vector.shape_cast %79 : vector<128xf32> to vector<1x128xf32>
    %c0_77 = arith.constant 0 : index
    %c0_78 = arith.constant 0 : index
    %81 = vector.load %arg6[%c0_77, %c0_78] : memref<128x2xf32, #tpu.memory_space<vmem>>, vector<128x2xf32>
    %cst_79 = arith.constant dense<0.000000e+00> : vector<1x2xf32>
    %82 = tpu.matmul %80, %81, %cst_79 {dimension_numbers = #tpu.dot_dimension_numbers<[1], [0], [0], [1], [0, 0, 1, 1], [], []>} : vector<1x128xf32>, vector<128x2xf32>, vector<1x2xf32> -> vector<1x2xf32>
    %c0_80 = arith.constant 0 : index
    %c0_81 = arith.constant 0 : index
    %83 = vector.load %arg7[%c0_80, %c0_81] : memref<1x2xf32, #tpu.memory_space<vmem>>, vector<1x2xf32>
    %84 = arith.addf %82, %83 : vector<1x2xf32>
    %cst_82 = arith.constant 0.000000e+00 : f32
    %85 = vector.broadcast %cst_82 : f32 to vector<1x2xf32>
    %86 = arith.maximumf %84, %85 : vector<1x2xf32>
    %c0_83 = arith.constant 0 : index
    %c0_84 = arith.constant 0 : index
    %87 = vector.load %arg8[%c0_83, %c0_84] : memref<2x128xf32, #tpu.memory_space<vmem>>, vector<2x128xf32>
    %cst_85 = arith.constant dense<0.000000e+00> : vector<1x128xf32>
    %88 = tpu.matmul %86, %87, %cst_85 {dimension_numbers = #tpu.dot_dimension_numbers<[1], [0], [0], [1], [0, 0, 1, 1], [], []>} : vector<1x2xf32>, vector<2x128xf32>, vector<1x128xf32> -> vector<1x128xf32>
    %c0_86 = arith.constant 0 : index
    %c0_87 = arith.constant 0 : index
    %89 = vector.load %arg9[%c0_86, %c0_87] : memref<1x128xf32, #tpu.memory_space<vmem>>, vector<1x128xf32>
    %90 = arith.addf %88, %89 : vector<1x128xf32>
    %91 = arith.negf %90 : vector<1x128xf32>
    %92 = math.exp %91 : vector<1x128xf32>
    %cst_88 = arith.constant 1.000000e+00 : f32
    %93 = vector.broadcast %cst_88 : f32 to vector<1x128xf32>
    %94 = arith.addf %93, %92 : vector<1x128xf32>
    %95 = arith.divf %93, %94 : vector<1x128xf32>
    %96 = vector.broadcast %95 : vector<1x128xf32> to vector<16x128xf32>
    %97 = arith.mulf %34, %96 : vector<16x128xf32>
    %98 = arith.addf %97, %78 : vector<16x128xf32>
    %cst_89 = arith.constant 0.000000e+00 : f32
    %99 = vector.broadcast %cst_89 : f32 to vector<16x128xf32>
    %100 = arith.cmpf ogt, %98, %99 : vector<16x128xf32>
    %cst_90 = arith.constant 0.000000e+00 : f32
    %101 = vector.broadcast %cst_90 : f32 to vector<16x128xf32>
    %102 = arith.minimumf %98, %101 : vector<16x128xf32>
    %103 = math.exp %102 : vector<16x128xf32>
    %cst_91 = arith.constant 1.000000e+00 : f32
    %104 = vector.broadcast %cst_91 : f32 to vector<16x128xf32>
    %105 = arith.subf %103, %104 : vector<16x128xf32>
    %106 = arith.select %100, %98, %105 : vector<16x128xi1>, vector<16x128xf32>
    %107 = vector.shape_cast %106 : vector<16x128xf32> to vector<1x16x128xf32>
    %c0_92 = arith.constant 0 : index
    %c0_93 = arith.constant 0 : index
    %c0_94 = arith.constant 0 : index
    %108 = vector.load %arg10[%c0_92, %c0_93, %c0_94] : memref<1x16x128xf32, #tpu.memory_space<vmem>>, vector<1x16x128xf32>
    tpu.vector_store %arg10[%c0_92, %c0_93, %c0_94], %107 {strides = array<i32>} : memref<1x16x128xf32, #tpu.memory_space<vmem>>, vector<1x16x128xf32>,
    return
  }
  func.func @transform_0(%arg0: i32) -> (i32, i32, i32) {
    %c0_i32 = arith.constant 0 : i32
    %c0_i32_0 = arith.constant 0 : i32
    %c0_i32_1 = arith.constant 0 : i32
    return %arg0, %c0_i32, %c0_i32_0 : i32, i32, i32
  }
  func.func @transform_1(%arg0: i32) -> (i32, i32, i32) {
    %c0_i32 = arith.constant 0 : i32
    %c0_i32_0 = arith.constant 0 : i32
    %c0_i32_1 = arith.constant 0 : i32
    %c0_i32_2 = arith.constant 0 : i32
    return %c0_i32, %c0_i32_0, %c0_i32_1 : i32, i32, i32
  }
  func.func @transform_2(%arg0: i32) -> (i32, i32, i32) {
    %c0_i32 = arith.constant 0 : i32
    %c0_i32_0 = arith.constant 0 : i32
    %c0_i32_1 = arith.constant 0 : i32
    %c0_i32_2 = arith.constant 0 : i32
    return %c0_i32, %c0_i32_0, %c0_i32_1 : i32, i32, i32
  }
  func.func @transform_3(%arg0: i32) -> (i32, i32, i32) {
    %c0_i32 = arith.constant 0 : i32
    %c0_i32_0 = arith.constant 0 : i32
    %c0_i32_1 = arith.constant 0 : i32
    %c0_i32_2 = arith.constant 0 : i32
    return %c0_i32, %c0_i32_0, %c0_i32_1 : i32, i32, i32
  }
  func.func @transform_4(%arg0: i32) -> (i32, i32) {
    %c0_i32 = arith.constant 0 : i32
    %c0_i32_0 = arith.constant 0 : i32
    %c0_i32_1 = arith.constant 0 : i32
    return %c0_i32, %c0_i32_0 : i32, i32
  }
  func.func @transform_5(%arg0: i32) -> (i32, i32) {
    %c0_i32 = arith.constant 0 : i32
    %c0_i32_0 = arith.constant 0 : i32
    %c0_i32_1 = arith.constant 0 : i32
    return %c0_i32, %c0_i32_0 : i32, i32
  }
  func.func @transform_6(%arg0: i32) -> (i32, i32) {
    %c0_i32 = arith.constant 0 : i32
    %c0_i32_0 = arith.constant 0 : i32
    %c0_i32_1 = arith.constant 0 : i32
    return %c0_i32, %c0_i32_0 : i32, i32
  }
  func.func @transform_7(%arg0: i32) -> (i32, i32) {
    %c0_i32 = arith.constant 0 : i32
    %c0_i32_0 = arith.constant 0 : i32
    %c0_i32_1 = arith.constant 0 : i32
    return %c0_i32, %c0_i32_0 : i32, i32
  }
  func.func @transform_8(%arg0: i32) -> (i32, i32) {
    %c0_i32 = arith.constant 0 : i32
    %c0_i32_0 = arith.constant 0 : i32
    %c0_i32_1 = arith.constant 0 : i32
    return %c0_i32, %c0_i32_0 : i32, i32
  }
  func.func @transform_9(%arg0: i32) -> (i32, i32, i32) {
    %c0_i32 = arith.constant 0 : i32
    %c0_i32_0 = arith.constant 0 : i32
    %c0_i32_1 = arith.constant 0 : i32
    return %arg0, %c0_i32, %c0_i32_0 : i32, i32, i32
  }
}

</mosaic_0001>

<bundles_post_ra>
// kernel: tpu_custom_call.1
= control target key start
LH: loop header
LB: loop body
LE: loop exit
PB: predicated region body
PF: predicated region fallthrough
CT: control target
= control target key end

     0   :  { %14 = vsyncpa [#allocation5], 0  ;;  %s2997_s0 = inlined_call_operand.vmem [shape: f32[2,16,64], index: 0, kind: input, shape index: {}]   ;;  %s2998_s1 = inlined_call_operand.hbm [shape: f32[3,64,128], index: 1, kind: input, shape index: {}]   ;;  %s2999_s2 = inlined_call_operand.hbm [shape: f32[3,128,128], index: 2, kind: input, shape index: {}]   ;;  %s3000_s3 = inlined_call_operand.hbm [shape: f32[3,128,128], index: 3, kind: input, shape index: {}]   ;;  %s3001_s4 = inlined_call_operand.vmem [shape: f32[3,128], index: 4, kind: input, shape index: {}]   ;;  %s3002_s5 = inlined_call_operand.vmem [shape: f32[128,2], index: 5, kind: input, shape index: {}]   ;;  %s3003_s6 = inlined_call_operand.vmem [shape: f32[1,2], index: 6, kind: input, shape index: {}]   ;;  %s3004_s7 = inlined_call_operand.vmem [shape: f32[2,128], index: 7, kind: input, shape index: {}]   ;;  %s3005_s8 = inlined_call_operand.vmem [shape: f32[1,128], index: 8, kind: input, shape index: {}]   ;;  %s3006_s9 = inlined_call_operand.hbm [shape: f32[2,16,128], index: 9, kind: output, shape index: {}]  }
   0x1   :  { %15 = vsyncpa [#allocation8], 0 }
   0x2   :  { %16 = vsyncpa [#allocation6], 0 }
   0x3   :  { %18 = vsyncpa [#allocation6 + $0x1], 0  ;;  %s2682_s30 = smov 0   ;;  %s2684_s10 = smov 0  }
   0x4   :  { %s2686_s11 = smov 0   ;;  %s2688_s12 = smov 0  }
   0x5 LB: > { %3015 = sst [smem:[#allocation14_spill]] %s2607_s30  ;;  %s2703_s13 = sadd.s32 4294967295, %s2619_s12   ;;  %s2619_s12 = sphi %s2688_s12, %s3034_s12   ;;  %s2615_s11 = sphi %s2686_s11, %s3036_s11   ;;  %s2611_s10 = sphi %s2684_s10, %s3038_s10   ;;  %s2607_s30 = sphi %s2682_s30, %s3037_s30  }
   0x6   : > { %3016 = sst [smem:[#allocation15_spill]] %s2615_s11  ;;  %s1591_s14 = sadd.s32 4294967294, %s2619_s12  }
   0x7   : > { %s2707_s15 = sadd.s32 1, %s2619_s12   ;;  %s225_s16 = sadd.s32 1, %s2615_s11 }
   0x8   : > { %3017 = sst [smem:[#allocation16_spill]] %s2707_s15  ;;  %s222_s17 = ssub.s32 %s2619_s12, %s2707_s15 }
   0x9   : > { %p235_p0 = scmp.ne.s32.totalorder %s2615_s11, %s2611_s10  ;;  %p223_p1 = scmp.eq.s32.totalorder %s222_s17, 0 }
   0xa   : > { %p236_p2 = scmp.eq.s32.totalorder %s2703_s13, 1  ;;  %p241_p3 = scmp.ne.s32.totalorder %s2611_s10, %s2607_s30 }
   0xb   : > { %p242_p4 = scmp.eq.s32.totalorder %s1591_s14, 1  ;;  %p1592_p7 = scmp.ge.s32.totalorder %s2619_s12, 1 }
   0xc   : > { %s2718_s18 = scalar_select %p223_p1, %s2615_s11, %s225_s16  }
   0xd   : > { %p2720_p5 = por %p236_p2, %p235_p0  ;;  %p2724_p6 = por %p242_p4, %p241_p3 }
   0xe   : > { %3018 = sst [smem:[#allocation17_spill]] %s2718_s18  ;;  %p249_p8 = scmp.lt.s32.totalorder %s2619_s12, 3 }
   0xf   : > { %s3019_s19 = scalar_select %p2720_p5, 1, 0 }
  0x10   : > { %s3020_s20 = scalar_select %p2724_p6, 1, 0 }
  0x11   : > { %p3007_p9 = scmp.eq.s32.totalorder %s2703_s13, 0  ;;  %p2731_p10 = pnand %p1592_p7, %p249_p8 }
  0x12   : > { %3021 = sst [smem:[#allocation18_spill]] %s3020_s20  ;;  %s2621_s22 = smov [#allocation7]  }
  0x13   : > { %s3022_s21 = scalar_select %p2731_p10, 1, 0 }
  0x14   : > { %p2386_p11 = pneg %p2731_p10  ;;  %s274_s23 = sshll.u32 %s2621_s22, 4  ;;  %s2737_s23 = int_to_ptr.vmem [resolvable:$true] %s274_s23 }
  0x15   : > { %s2622_s25 = smov [#allocation4]   ;;  %s2623_s27 = smov [#allocation9]  }
  0x16   : > { %p2741_p12 = pnand %p3007_p9, %p2386_p11  ;;  %s261_s26 = sshll.u32 %s2622_s25, 4  ;;  %s2745_s26 = int_to_ptr.vmem [resolvable:$true] %s261_s26 }
  0x17   : > { %s2747_s28 = sshll.u32 %s2623_s27, 4  ;;  %s2465_s16 = scalar_lea.hbm %s2999_s2, 6144  ;;  %s288_s28 = int_to_ptr.vmem [resolvable:$true] %s2747_s28 }
  0x18   : > { %p2466_p13 = scmp.ne.s32.totalorder %s2999_s2, %s2465_s16  ;;  %p2757_p0 = pneg %p2741_p12 }
  0x19   : > { %p2472_p3 = scmp.lt.u32.totalorder %s2465_s16, %s2999_s2 }
  0x1a   : > { %p2468_p1 = pnand %p2757_p0, %p2466_p13 }
  0x1c   : > { %p2469_p2 = pneg %p2468_p1 }
  0x1e   : > { %p2474_p4 = pnand %p2472_p3, %p2469_p2 }
  0x20   : > { %2477 = shalt.err (!%p2474_p4)
}
  0x21   : > { %s2478_s29 = scalar_lea.vmem %s2737_s23, 6144  ;;  %p2486_p9 = scmp.lt.s32.totalorder %s2737_s23, %s2737_s23 }
  0x22   : > { %p2479_p7 = scmp.ne.s32.totalorder %s2737_s23, %s2478_s29  ;;  %p2487_p6 = scmp.lt.s32.totalorder %s2478_s29, %s2478_s29 }
  0x24   : > { %p2481_p8 = pnand %p2479_p7, %p2757_p0  ;;  %p2488_p13 = por %p2487_p6, %p2486_p9 }
  0x26   : > { %p2482_p11 = pneg %p2481_p8 }
  0x28   : > { %p2489_p1 = pnand %p2488_p13, %p2482_p11 }
  0x2a   : > { %2492 = shalt.err (!%p2489_p1)
}
  0x2b   : > { %s2624_s14 = smov 128   ;;  %s2625_s16 = smov 8  }
  0x2c   : > { %2392 = dma.hbm_to_vmem [thread:$0]  (!%p2741_p12), %s2999_s2, 6144, %s2737_s23, [#allocation8], %s2624_s14, %s2624_s14, %s2625_s16  }
  0x2d   : > { %s2493_s29 = scalar_lea.hbm %s2998_s1, 3072 }
  0x2e   : > { %p2494_p6 = scmp.ne.s32.totalorder %s2998_s1, %s2493_s29  ;;  %p2500_p3 = scmp.lt.u32.totalorder %s2493_s29, %s2998_s1 }
  0x30   : > { %p2496_p9 = pnand %p2494_p6, %p2757_p0 }
  0x32   : > { %p2497_p2 = pneg %p2496_p9 }
  0x34   : > { %p2502_p4 = pnand %p2500_p3, %p2497_p2 }
  0x36   : > { %2505 = shalt.err (!%p2502_p4)
}
  0x37   : > { %s2506_s23 = scalar_lea.vmem %s2745_s26, 3072  ;;  %p2514_p13 = scmp.lt.s32.totalorder %s2745_s26, %s2745_s26 }
  0x38   : > { %p2507_p7 = scmp.ne.s32.totalorder %s2745_s26, %s2506_s23  ;;  %p2515_p1 = scmp.lt.s32.totalorder %s2506_s23, %s2506_s23 }
  0x3a   : > { %p2509_p8 = pnand %p2507_p7, %p2757_p0  ;;  %p2516_p6 = por %p2515_p1, %p2514_p13 }
  0x3c   : > { %p2510_p11 = pneg %p2509_p8 }
  0x3e   : > { %p2517_p9 = pnand %p2516_p6, %p2510_p11 }
  0x40   : > { %2520 = shalt.err (!%p2517_p9)
}
  0x41   : > { %2389 = dma.hbm_to_vmem [thread:$0]  (!%p2741_p12), %s2998_s1, 3072, %s2745_s26, [#allocation5], %s2624_s14, %s2624_s14, %s2625_s16  }
  0x42   : > { %s2521_s17 = scalar_lea.hbm %s3000_s3, 6144 }
  0x43   : > { %p2522_p2 = scmp.ne.s32.totalorder %s3000_s3, %s2521_s17  ;;  %p2528_p7 = scmp.lt.u32.totalorder %s2521_s17, %s3000_s3 }
  0x45   : > { %p2524_p3 = pnand %p2522_p2, %p2757_p0 }
  0x47   : > { %p2525_p4 = pneg %p2524_p3 }
  0x49   : > { %p2530_p8 = pnand %p2528_p7, %p2525_p4 }
  0x4b   : > { %2533 = shalt.err (!%p2530_p8)
}
  0x4c   : > { %s2534_s23 = scalar_lea.vmem %s288_s28, 6144  ;;  %p2542_p6 = scmp.lt.s32.totalorder %s288_s28, %s288_s28 }
  0x4d   : > { %p2535_p11 = scmp.ne.s32.totalorder %s288_s28, %s2534_s23  ;;  %p2543_p9 = scmp.lt.s32.totalorder %s2534_s23, %s2534_s23 }
  0x4f   : > { %p2537_p13 = pnand %p2535_p11, %p2757_p0  ;;  %p2544_p5 = por %p2543_p9, %p2542_p6 }
  0x51   : > { %p2538_p1 = pneg %p2537_p13 }
  0x53   : > { %p2545_p10 = pnand %p2544_p5, %p2538_p1 }
  0x55   : > { %2548 = shalt.err (!%p2545_p10)
}
  0x56   : > { %2395 = dma.hbm_to_vmem [thread:$0]  (!%p2741_p12), %s3000_s3, 6144, %s288_s28, [#allocation8], %s2624_s14, %s2624_s14, %s2625_s16  }
  0x57   : > { %p3025_p2 = scmp.ne.s32.totalorder %s3022_s21, 0 }
  0x58   : > { %p3026_p0 = scmp.eq.s32.totalorder (!%p3025_p2), %s2703_s13, 0 }
  0x59   : > { %326 = sbr.rel (%p3025_p2) target bundleno = 1013 (0x3f5), region = 56 }
  0x60   : > { %2594 = dma.done.wait (%p3026_p0), [#allocation5], 3072   ;;  %p3027_p3 = pmov %p3026_p0 }
  0x61   : > { %p3028_p5 = pmov %p3026_p0 }
  0x62   : > { %2596 = vsyncadd (%p3027_p3), [#allocation5], 4294964224 }
  0x63   : > { %2598 = dma.done.wait (%p3028_p5), [#allocation8], 12288   ;;  %p3029_p10 = pmov %p3026_p0 }
  0x64   : > { %p370_p4 = scmp.lt.s32.totalorder %s2703_s13, 1  ;;  %vm375_vm0 = vcmask 516096   ;;  %v2626_v0 = vmov 0.0   ;;  %v388_v1 = vld [vmem:[#allocation4] sm:$0xff]  ;;  %v389_v2 = vld [vmem:[#allocation4 + $0x8] sm:$0xff]  ;;  %v390_v3 = vld [vmem:[#allocation4 + $0x10] sm:$0xff] }
  0x65   : > { %2600 = vsyncadd (%p3029_p10), [#allocation8], 4294955008  ;;  %376 = vst.msk [vmem:[#allocation2] sm:$0x1] %vm375_vm0, %v2626_v0  ;;  %vm383_vm1 = vcmask 523264   ;;  %v2090_v4 = vpack.c.bf16 %v389_v2, %v388_v1  ;;  %v391_v5 = vld [vmem:[#allocation4 + $0x18] sm:$0xff] }
  0x66   : > { %377 = vst.msk [vmem:[#allocation2 + $0x11] sm:$0x1] %vm375_vm0, %v2626_v0  ;;  %378 = vst [vmem:[#allocation3] sm:$0x1] %v2626_v0  ;;  %s371_s18 = scalar_select %p370_p4, %s2703_s13, 1  ;;  %v2094_v6 = vpack.c.bf16 %v391_v5, %v390_v3  ;;  %v392_v7 = vld [vmem:[#allocation4 + $0x20] sm:$0xff] }
  0x67   : > { %379 = vst [vmem:[#allocation3 + $0x11] sm:$0x1] %v2626_v0  ;;  %v393_v8 = vld [vmem:[#allocation4 + $0x28] sm:$0xff]  ;;  %2091 = vmatprep.subr.bf16.mxu0 %v2090_v4  ;;  %v394_v12 = vld [vmem:[#allocation4 + $0x30] sm:$0xff]  ;;  %v395_v13 = vld [vmem:[#allocation4 + $0x38] sm:$0xff]  ;;  %vm2628_vm4 = vmmov 0  }
  0x68   : > { %s1624_s21 = sshll.u32 %s371_s18, 4  ;;  %2093 = vmatpush3.bf16.msra.mxu0 %v2090_v4  ;;  %v2098_v11 = vpack.c.bf16 %v393_v8, %v392_v7  ;;  %v687_v14 = vld [vmem:[#allocation7] sm:$0xff]  ;;  %v2102_v15 = vpack.c.bf16 %v395_v13, %v394_v12  ;;  %v688_v16 = vld [vmem:[#allocation7 + $0x8] sm:$0xff]  ;;  %v488_v22 = vld [vmem:[#allocation4 + $0x50] sm:$0xff]  ;;  %vm1382_vm5 = vcmask 1041408   ;;  %vm1378_vm8 = vcmask 15360  }
  0x69   : > { %s374_s14 = scalar_lea.vmem %s2997_s0, %s1624_s21  ;;  %2095 = vmatprep.subr.bf16.mxu0 %v2094_v6  ;;  %v486_v18 = vld [vmem:[#allocation4 + $0x40] sm:$0xff]  ;;  %v487_v19 = vld [vmem:[#allocation4 + $0x48] sm:$0xff]  ;;  %v2138_v20 = vpack.c.bf16 %v688_v16, %v687_v14  ;;  %v489_v23 = vld [vmem:[#allocation4 + $0x58] sm:$0xff]  ;;  %s367_s25 = sand.u32 1, %s2611_s10  }
  0x6a   : > { %v381_v9 = vld [vmem:[%s374_s14] sm:$0xff]  ;;  %v382_v10 = vld [vmem:[%s374_s14 + $0x8] sm:$0xff]  ;;  %v2106_v21 = vpack.c.bf16 %v487_v19, %v486_v18  ;;  %v2110_v25 = vpack.c.bf16 %v489_v23, %v488_v22  ;;  %v490_v27 = vld [vmem:[#allocation4 + $0x60] sm:$0xff]  ;;  %s1601_s27 = sshll.u32 %s367_s25, 4  ;;  %s1625_s26 = sshll.u32 %s2703_s13, 8 }
  0x6b   : > { %384 = vst.msk [vmem:[#allocation2 + $0x1] sm:$0xff] %vm383_vm1, %v381_v9  ;;  %385 = vst.msk [vmem:[#allocation2 + $0x9] sm:$0xff] %vm383_vm1, %v382_v10  ;;  %2139 = vmatprep.subr.bf16.mxu1 %v2138_v20  ;;  %v491_v28 = vld [vmem:[#allocation4 + $0x68] sm:$0xff]  ;;  %v492_v30 = vld [vmem:[#allocation4 + $0x70] sm:$0xff]  ;;  %v477_v9 = vlaneseq  ;;  %s369_s29 = scalar_lea.vmem [#allocation10], %s1601_s27  ;;  %s2954_s21 = scalar_lea.hbm %s3006_s9, %s1625_s26 }
  0x6c   : > { %2097 = vmatpush3.bf16.msra.mxu0 %v2094_v6  ;;  %2141 = vmatpush3.bf16.msra.mxu1 %v2138_v20  ;;  %v2114_v29 = vpack.c.bf16 %v491_v28, %v490_v27  ;;  %v493_v31 = vld [vmem:[#allocation4 + $0x78] sm:$0xff]  ;;  %v580_v33 = vld [vmem:[#allocation4 + $0x80] sm:$0xff]  ;;  %v581_v34 = vld [vmem:[#allocation4 + $0x88] sm:$0xff]  ;;  %s1498_s23 = sshll.u32 %s369_s29, 4  ;;  %s2956_s13 = scalar_lea.sflag [#allocation6], %s367_s25  ;;  %s2949_s23 = int_to_ptr.vmem [resolvable:$true] %s1498_s23 }
  0x6d   : > { %2099 = vmatprep.subr.bf16.mxu0 %v2098_v11  ;;  %v2118_v32 = vpack.c.bf16 %v493_v31, %v492_v30  ;;  %v2122_v35 = vpack.c.bf16 %v581_v34, %v580_v33  ;;  %v582_v36 = vld [vmem:[#allocation4 + $0x90] sm:$0xff]  ;;  %v583_v37 = vld [vmem:[#allocation4 + $0x98] sm:$0xff]  ;;  %v584_v41 = vld [vmem:[#allocation4 + $0xa0] sm:$0xff]  ;;  %v2856_v10 = vshrl.u32 %v477_v9, 7  ;;  %s2549_s24 = scalar_lea.vmem %s2949_s23, 256  ;;  %p3030_p7 = scmp.ne.s32.totalorder %s3019_s19, 0 }
  0x6e   : > { %v2126_v39 = vpack.c.bf16 %v583_v37, %v582_v36  ;;  %v585_v42 = vld [vmem:[#allocation4 + $0xa8] sm:$0xff]  ;;  %v586_v44 = vld [vmem:[#allocation4 + $0xb0] sm:$0xff]  ;;  %v587_v45 = vld [vmem:[#allocation4 + $0xb8] sm:$0xff]  ;;  %p2550_p12 = scmp.ne.s32.totalorder %s2949_s23, %s2549_s24  ;;  %s2629_s28 = smov [#allocation10]  }
  0x6f   : > { %v2130_v43 = vpack.c.bf16 %v585_v42, %v584_v41  ;;  %v2134_v46 = vpack.c.bf16 %v587_v45, %v586_v44  ;;  %v689_v48 = vld [vmem:[#allocation7 + $0x10] sm:$0xff]  ;;  %v690_v49 = vld [vmem:[#allocation7 + $0x18] sm:$0xff]  ;;  %v691_v51 = vld [vmem:[#allocation7 + $0x20] sm:$0xff]  ;;  %s2553_s14 = sshll.u32 %s2629_s28, 4  ;;  %s2554_s14 = int_to_ptr.vmem [resolvable:$false] %s2553_s14 }
  0x70   : > { %2101 = vmatpush3.bf16.msra.mxu0 %v2098_v11  ;;  %v2142_v50 = vpack.c.bf16 %v690_v49, %v689_v48  ;;  %v692_v52 = vld [vmem:[#allocation7 + $0x28] sm:$0xff]  ;;  %v693_v54 = vld [vmem:[#allocation7 + $0x30] sm:$0xff]  ;;  %v694_v55 = vld [vmem:[#allocation7 + $0x38] sm:$0xff]  ;;  %v479_v11 = vsub.s32 0, %v2856_v10  ;;  %p2551_p8 = pnand %p2550_p12, %p3030_p7  ;;  %s2555_s16 = scalar_lea.vmem %s2554_s14, 512 }
  0x71   : > { %2103 = vmatprep.subr.bf16.mxu0 %v2102_v15  ;;  %v2146_v53 = vpack.c.bf16 %v692_v52, %v691_v51  ;;  %v2150_v56 = vpack.c.bf16 %v694_v55, %v693_v54  ;;  %v695_v57 = vld [vmem:[#allocation7 + $0x40] sm:$0xff]  ;;  %v696_v58 = vld [vmem:[#allocation7 + $0x48] sm:$0xff]  ;;  %v697_v60 = vld [vmem:[#allocation7 + $0x50] sm:$0xff]  ;;  %p2556_p13 = scmp.lt.s32.totalorder %s2949_s23, %s2554_s14  ;;  %p2557_p1 = scmp.lt.s32.totalorder %s2555_s16, %s2549_s24 }
  0x72   : > { %v386_v17 = vld [vmem:[#allocation2] sm:$0xff]  ;;  %v387_v24 = vld [vmem:[#allocation2 + $0x8] sm:$0xff]  ;;  %2143 = vmatprep.subr.bf16.mxu1 %v2142_v50  ;;  %v2154_v59 = vpack.c.bf16 %v696_v58, %v695_v57  ;;  %v699_v63 = vld [vmem:[#allocation7 + $0x60] sm:$0xff]  ;;  %p2552_p11 = pneg %p2551_p8 }
  0x73   : > { %1799 = vmatprep.mubr.msk.f32.mxu0 %vm383_vm1, %v386_v17  ;;  %v483_v26 = vld [vmem:[#allocation2 + $0x1] sm:$0xff]  ;;  %v484_v38 = vld [vmem:[#allocation2 + $0x9] sm:$0xff]  ;;  %2145 = vmatpush3.bf16.msra.mxu1 %v2142_v50  ;;  %v700_v1 = vld [vmem:[#allocation7 + $0x68] sm:$0xff]  ;;  %p2558_p6 = por %p2557_p1, %p2556_p13 }
  0x74   : > { %2105 = vmatpush3.bf16.msra.mxu0 %v2102_v15  ;;  %v577_v40 = vld [vmem:[#allocation2 + $0x2] sm:$0xff]  ;;  %v578_v47 = vld [vmem:[#allocation2 + $0xa] sm:$0xff]  ;;  %2147 = vmatprep.subr.bf16.mxu1 %v2146_v53  ;;  %v2162_v2 = vpack.c.bf16 %v700_v1, %v699_v63  ;;  %v788_v7 = vld [vmem:[#allocation7 + $0x88] sm:$0xff] }
  0x75   : > { %2107 = vmatprep.subr.bf16.mxu0 %v2106_v21  ;;  %v698_v61 = vld [vmem:[#allocation7 + $0x58] sm:$0xff]  ;;  %v701_v3 = vld [vmem:[#allocation7 + $0x70] sm:$0xff]  ;;  %v787_v6 = vld [vmem:[#allocation7 + $0x80] sm:$0xff]  ;;  %p2559_p9 = pnand %p2558_p6, %p2552_p11 }
  0x76   : > { %v2158_v62 = vpack.c.bf16 %v698_v61, %v697_v60  ;;  %v702_v4 = vld [vmem:[#allocation7 + $0x78] sm:$0xff]  ;;  %v2170_v8 = vpack.c.bf16 %v788_v7, %v787_v6  ;;  %v2862_v12 = vld [vmem:[%s3001_s4] sm:$0x7]  ;;  %v992_v14 = vld [vmem:[#allocation9] sm:$0xff] }
  0x77   : > { %1800 = vmatmul.mubr.msk.f32.vlgmr.msra.gmra.mrb[0].mxu0 %vm383_vm1, %v387_v24  ;;  %2149 = vmatpush3.bf16.msra.mxu1 %v2146_v53  ;;  %v2166_v5 = vpack.c.bf16 %v702_v4, %v701_v3  ;;  %v480_v13 = vrot.slane %v2862_v12, %v479_v11  ;;  %v993_v15 = vld [vmem:[#allocation9 + $0x8] sm:$0xff]  ;;  %v789_v31 = vld [vmem:[#allocation7 + $0x90] sm:$0xff]  ;;  %v791_v36 = vld [vmem:[#allocation7 + $0xa0] sm:$0xff] }
  0x78   : > { %2109 = vmatpush3.bf16.msra.mxu0 %v2106_v21  ;;  %1818 = vmatprep.mubr.msk.f32.mxu0 %vm383_vm1, %v483_v26  ;;  %v2234_v17 = vpack.c.bf16 %v993_v15, %v992_v14  ;;  %v792_v37 = vld [vmem:[#allocation7 + $0xa8] sm:$0xff]  ;;  %v795_v42 = vld [vmem:[#allocation7 + $0xc0] sm:$0xff]  ;;  %v797_v45 = vld [vmem:[#allocation7 + $0xd0] sm:$0xff] }
  0x79   : > { %2111 = vmatprep.subr.bf16.mxu0 %v2110_v25  ;;  %2151 = vmatprep.subr.bf16.mxu1 %v2150_v56  ;;  %v799_v48 = vld [vmem:[#allocation7 + $0xe0] sm:$0xff]  ;;  %v800_v49 = vld [vmem:[#allocation7 + $0xe8] sm:$0xff]  ;;  %v801_v51 = vld [vmem:[#allocation7 + $0xf0] sm:$0xff] }
  0x7a   : > { %v2194_v50 = vpack.c.bf16 %v800_v49, %v799_v48  ;;  %v802_v52 = vld [vmem:[#allocation7 + $0xf8] sm:$0xff]  ;;  %v883_v54 = vld [vmem:[#allocation7 + $0x100] sm:$0xff]  ;;  %v884_v55 = vld [vmem:[#allocation7 + $0x108] sm:$0xff] }
  0x7b   : > { %2153 = vmatpush3.bf16.msra.mxu1 %v2150_v56  ;;  %v2198_v53 = vpack.c.bf16 %v802_v52, %v801_v51  ;;  %v2202_v56 = vpack.c.bf16 %v884_v55, %v883_v54  ;;  %v885_v57 = vld [vmem:[#allocation7 + $0x110] sm:$0xff]  ;;  %v886_v58 = vld [vmem:[#allocation7 + $0x118] sm:$0xff]  ;;  %v887_v60 = vld [vmem:[#allocation7 + $0x120] sm:$0xff] }
  0x7c   : > { %2113 = vmatpush3.bf16.msra.mxu0 %v2110_v25  ;;  %2155 = vmatprep.subr.bf16.mxu1 %v2154_v59  ;;  %v888_v61 = vld [vmem:[#allocation7 + $0x128] sm:$0xff]  ;;  %v889_v1 = vld [vmem:[#allocation7 + $0x130] sm:$0xff]  ;;  %v891_v4 = vld [vmem:[#allocation7 + $0x140] sm:$0xff] }
  0x7d   : > { %2115 = vmatprep.subr.bf16.mxu0 %v2114_v29  ;;  %v2210_v63 = vpack.c.bf16 %v888_v61, %v887_v60  ;;  %v893_v7 = vld [vmem:[#allocation7 + $0x150] sm:$0xff]  ;;  %v896_v14 = vld [vmem:[#allocation7 + $0x168] sm:$0xff]  ;;  %v1302_v48 = vld [vmem:[%s3002_s5 + $0x70] sm:$0xff] }
  0x7e   : > { %v1303_v49 = vld [vmem:[%s3002_s5 + $0x78] sm:$0xff]  ;;  %v994_v54 = vld [vmem:[#allocation9 + $0x10] sm:$0xff]  ;;  %v995_v55 = vld [vmem:[#allocation9 + $0x18] sm:$0xff] }
  0x7f   : > { %2157 = vmatpush3.bf16.msra.mxu1 %v2154_v59  ;;  %v2206_v59 = vpack.c.bf16 %v886_v58, %v885_v57  ;;  %v2352_v51 = vpack.c.bf16 %v1303_v49, %v1302_v48  ;;  %v996_v57 = vld [vmem:[#allocation9 + $0x20] sm:$0xff]  ;;  %v997_v58 = vld [vmem:[#allocation9 + $0x28] sm:$0xff]  ;;  %v998_v60 = vld [vmem:[#allocation9 + $0x30] sm:$0xff] }
  0x80   : > { %2117 = vmatpush3.bf16.msra.mxu0 %v2114_v29  ;;  %2159 = vmatprep.subr.bf16.mxu1 %v2158_v62  ;;  %v999_v61 = vld [vmem:[#allocation9 + $0x38] sm:$0xff]  ;;  %v1098_v48 = vld [vmem:[#allocation9 + $0xb0] sm:$0xff] }
  0x81   : > { %2119 = vmatprep.subr.bf16.mxu0 %v2118_v32  ;;  %v1099_v49 = vld [vmem:[#allocation9 + $0xb8] sm:$0xff] }
  0x83   : > { %2161 = vmatpush3.bf16.msra.mxu1 %v2158_v62 }
  0x84   : > { %2121 = vmatpush3.bf16.msra.mxu0 %v2118_v32  ;;  %2163 = vmatprep.subr.bf16.mxu1 %v2162_v2  ;;  %v790_v32 = vld [vmem:[#allocation7 + $0x98] sm:$0xff] }
  0x85   : > { %2123 = vmatprep.subr.bf16.mxu0 %v2122_v35 }
  0x87   : > { %1819 = vmatmul.mubr.msk.f32.vlgmr.msra.gmra.mrb[0].mxu0 %vm383_vm1, %v484_v38  ;;  %2165 = vmatpush3.bf16.msra.mxu1 %v2162_v2  ;;  %v2178_v38 = vpack.c.bf16 %v792_v37, %v791_v36  ;;  %v890_v2 = vld [vmem:[#allocation7 + $0x138] sm:$0xff]  ;;  %v1296_v37 = vld [vmem:[%s3002_s5 + $0x40] sm:$0xff] }
  0x88   : > { %2125 = vmatpush3.bf16.msra.mxu0 %v2122_v35  ;;  %1837 = vmatprep.mubr.msk.f32.mxu0 %vm383_vm1, %v577_v40  ;;  %v2174_v35 = vpack.c.bf16 %v790_v32, %v789_v31  ;;  %v794_v40 = vld [vmem:[#allocation7 + $0xb8] sm:$0xff]  ;;  %v2214_v3 = vpack.c.bf16 %v890_v2, %v889_v1  ;;  %v1001_v1 = vld [vmem:[#allocation9 + $0x48] sm:$0xff] }
  0x89   : > { %2127 = vmatprep.subr.bf16.mxu0 %v2126_v39  ;;  %2167 = vmatprep.subr.bf16.mxu1 %v2166_v5 }
  0x8b   : > { %2169 = vmatpush3.bf16.msra.mxu1 %v2166_v5  ;;  %v892_v5 = vld [vmem:[#allocation7 + $0x148] sm:$0xff] }
  0x8c   : > { %2129 = vmatpush3.bf16.msra.mxu0 %v2126_v39  ;;  %2171 = vmatprep.subr.bf16.mxu1 %v2170_v8  ;;  %v793_v39 = vld [vmem:[#allocation7 + $0xb0] sm:$0xff]  ;;  %v2218_v6 = vpack.c.bf16 %v892_v5, %v891_v4  ;;  %v1004_v5 = vld [vmem:[#allocation9 + $0x60] sm:$0xff] }
  0x8d   : > { %2131 = vmatprep.subr.bf16.mxu0 %v2130_v43  ;;  %v2182_v41 = vpack.c.bf16 %v794_v40, %v793_v39 }
  0x90   : > { %2133 = vmatpush3.bf16.msra.mxu0 %v2130_v43  ;;  %v796_v43 = vld [vmem:[#allocation7 + $0xc8] sm:$0xff] }
  0x91   : > { %2135 = vmatprep.subr.bf16.mxu0 %v2134_v46  ;;  %v2186_v44 = vpack.c.bf16 %v796_v43, %v795_v42  ;;  %v1299_v42 = vld [vmem:[%s3002_s5 + $0x58] sm:$0xff] }
  0x94   : > { %2137 = vmatpush3.bf16.msra.mxu0 %v2134_v46  ;;  %v798_v46 = vld [vmem:[#allocation7 + $0xd8] sm:$0xff] }
  0x95   : > { %2235 = vmatprep.subr.bf16.mxu0 %v2234_v17 }
  0x97   : > { %1838 = vmatmul.mubr.msk.f32.vlgmr.msra.gmra.mrb[0].mxu0 %vm383_vm1, %v578_v47  ;;  %v2190_v47 = vpack.c.bf16 %v798_v46, %v797_v45  ;;  %v1300_v45 = vld [vmem:[%s3002_s5 + $0x60] sm:$0xff]  ;;  %v1301_v46 = vld [vmem:[%s3002_s5 + $0x68] sm:$0xff] }
  0x98   : > { %2237 = vmatpush3.bf16.msra.mxu0 %v2234_v17  ;;  %v898_v17 = vld [vmem:[#allocation7 + $0x178] sm:$0xff] }
 0x16a   : > { %v1839_v16 = vpop.f32.mrb[0].mxu0 }
 0x16b   : > { %v2354_v18 = vadd.f32 %v1839_v16, %v480_v13  ;;  %v660_v19 = vpop.f32.mrb[1].mxu0  ;;  %v897_v16 = vld [vmem:[#allocation7 + $0x170] sm:$0xff] }
 0x16c   : > { %v2355_v20 = vadd.f32 %v660_v19, %v480_v13  ;;  %v895_v13 = vld [vmem:[#allocation7 + $0x160] sm:$0xff]  ;;  %v1288_v19 = vld [vmem:[%s3002_s5] sm:$0xff] }
 0x16d   : > { %v674_v21 = vmin.f32 %v2354_v18, 0.0  ;;  %vm672_vm2 = vcmp.gt.f32.partialorder %v2354_v18, 0.0  ;;  %v2226_v15 = vpack.c.bf16 %v896_v14, %v895_v13  ;;  %v1092_v14 = vld [vmem:[#allocation9 + $0x80] sm:$0xff] }
 0x16e   : > { %v673_v22 = vmin.f32 %v2355_v20, 0.0  ;;  %vm671_vm3 = vcmp.gt.f32.partialorder %v2355_v20, 0.0 }
 0x16f   : > { %v677_v23 = vmul.f32 1.442695, %v674_v21 }
 0x170   : > { %v675_v24 = vmul.f32 1.442695, %v673_v22  ;;  %v2627_v22 = vmov 0.0|0.0  }
 0x171   : > { %2449 = vpow2.f32 %v677_v23  ;;  %v1290_v23 = vld [vmem:[%s3002_s5 + $0x10] sm:$0xff] }
 0x172   : > { %2451 = vpow2.f32 %v675_v24  ;;  %v1291_v24 = vld [vmem:[%s3002_s5 + $0x18] sm:$0xff] }
 0x17b   : > { %v2450_v25 = vpop.eup %2449 }
 0x17c   : > { %v2452_v26 = vpop.eup %2451  ;;  %v1611_v27 = vadd.f32 -1.0, %v2450_v25 }
 0x17d   : > { %v1610_v28 = vadd.f32 -1.0, %v2452_v26  ;;  %v2334_v26 = vpack.c.bf16 %v1291_v24, %v1290_v23 }
 0x17e   : > { %v2867_v29 = vsel %vm672_vm2, %v2354_v18, %v1611_v27  ;;  %v2230_v18 = vpack.c.bf16 %v898_v17, %v897_v16  ;;  %v1292_v27 = vld [vmem:[%s3002_s5 + $0x20] sm:$0xff] }
 0x17f   : > { %684 = vst [vmem:[#allocation3 + $0x9] sm:$0xff] %v2867_v29  ;;  %v2870_v30 = vsel %vm671_vm3, %v2355_v20, %v1610_v28  ;;  %v1289_v20 = vld [vmem:[%s3002_s5 + $0x8] sm:$0xff]  ;;  %v1376_v17 = vld [vmem:[%s3004_s7] sm:$0x3] }
 0x180   : > { %683 = vst [vmem:[#allocation3 + $0x1] sm:$0xff] %v2870_v30  ;;  %v2331_v21 = vpack.c.bf16 %v1289_v20, %v1288_v19  ;;  %v1293_v28 = vld [vmem:[%s3002_s5 + $0x28] sm:$0xff]  ;;  %v1281_v32 = vadd.f32 %v2867_v29, %v2870_v30 }
 0x181   : > { %v2337_v31 = vpack.c.bf16 %v1293_v28, %v1292_v27 }
 0x182   : > { %v1282_v36 = vrot.slane %v1281_v32, 4 }
 0x184   : > { %v1283_v40 = vadd.f32 %v1282_v36, %v1281_v32  ;;  %v1094_v36 = vld [vmem:[#allocation9 + $0x90] sm:$0xff] }
 0x186   : > { %v881_v25 = vld [vmem:[#allocation3 + $0xa] sm:$0xff] }
 0x187   : > { %v685_v33 = vld [vmem:[#allocation3] sm:$0xff]  ;;  %v686_v34 = vld [vmem:[#allocation3 + $0x8] sm:$0xff] }
 0x188   : > { %1872 = vmatprep.mubr.f32.mxu1 %v685_v33  ;;  %v880_v62 = vld [vmem:[#allocation3 + $0x2] sm:$0xff]  ;;  %v1294_v33 = vld [vmem:[%s3002_s5 + $0x30] sm:$0xff] }
 0x189   : > { %1873 = vmatmul.mubr.f32.vlgmr.msra.gmra.mrb[0].mxu1 %v686_v34  ;;  %v1295_v34 = vld [vmem:[%s3002_s5 + $0x38] sm:$0xff] }
 0x18a   : > { %2173 = vmatpush3.bf16.msra.mxu1 %v2170_v8  ;;  %1907 = vmatprep.mubr.f32.mxu1 %v2870_v30  ;;  %v894_v8 = vld [vmem:[#allocation7 + $0x158] sm:$0xff] }
 0x18b   : > { %2175 = vmatprep.subr.bf16.mxu1 %v2174_v35  ;;  %v2222_v9 = vpack.c.bf16 %v894_v8, %v893_v7  ;;  %v1006_v8 = vld [vmem:[#allocation9 + $0x70] sm:$0xff] }
 0x18e   : > { %2177 = vmatpush3.bf16.msra.mxu1 %v2174_v35  ;;  %v2340_v35 = vpack.c.bf16 %v1295_v34, %v1294_v33 }
 0x18f   : > { %2179 = vmatprep.subr.bf16.mxu1 %v2178_v38 }
 0x192   : > { %2181 = vmatpush3.bf16.msra.mxu1 %v2178_v38  ;;  %v1297_v38 = vld [vmem:[%s3002_s5 + $0x48] sm:$0xff] }
 0x193   : > { %2183 = vmatprep.subr.bf16.mxu1 %v2182_v41  ;;  %v2343_v39 = vpack.c.bf16 %v1297_v38, %v1296_v37  ;;  %v1095_v37 = vld [vmem:[#allocation9 + $0x98] sm:$0xff] }
 0x196   : > { %2185 = vmatpush3.bf16.msra.mxu1 %v2182_v41  ;;  %v1298_v41 = vld [vmem:[%s3002_s5 + $0x50] sm:$0xff] }
 0x197   : > { %2187 = vmatprep.subr.bf16.mxu1 %v2186_v44  ;;  %v2346_v43 = vpack.c.bf16 %v1299_v42, %v1298_v41  ;;  %v1304_v41 = vld [vmem:[%s3003_s6] sm:$0x1]  ;;  %v1096_v42 = vld [vmem:[#allocation9 + $0xa0] sm:$0xff] }
 0x19a   : > { %2189 = vmatpush3.bf16.msra.mxu1 %v2186_v44  ;;  %v1284_v44 = vrot.slane %v1283_v40, 2 }
 0x19b   : > { %2191 = vmatprep.subr.bf16.mxu1 %v2190_v47 }
 0x19e   : > { %2193 = vmatpush3.bf16.msra.mxu1 %v2190_v47  ;;  %v2349_v47 = vpack.c.bf16 %v1301_v46, %v1300_v45 }
 0x19f   : > { %2195 = vmatprep.subr.bf16.mxu1 %v2194_v50 }
 0x1a2   : > { %2197 = vmatpush3.bf16.msra.mxu1 %v2194_v50  ;;  %v1285_v50 = vadd.f32 %v1284_v44, %v1283_v40  ;;  %v2270_v40 = vpack.c.bf16 %v1095_v37, %v1094_v36 }
 0x1a3   : > { %2199 = vmatprep.subr.bf16.mxu1 %v2198_v53 }
 0x1a4   : > { %v1286_v52 = vrot.slane %v1285_v50, 1 }
 0x1a6   : > { %2201 = vmatpush3.bf16.msra.mxu1 %v2198_v53  ;;  %v1287_v53 = vadd.f32 %v1286_v52, %v1285_v50  ;;  %v1100_v52 = vld [vmem:[#allocation9 + $0xc0] sm:$0xff] }
 0x1a7   : > { %2203 = vmatprep.subr.bf16.mxu1 %v2202_v56 }
 0x1a9   : > { %1908 = vmatmul.mubr.f32.vlgmr.msra.gmra.mrb[0].mxu1 %v2867_v29 }
 0x1aa   : > { %2205 = vmatpush3.bf16.msra.mxu1 %v2202_v56  ;;  %1942 = vmatprep.mubr.f32.mxu1 %v880_v62  ;;  %v2238_v56 = vpack.c.bf16 %v995_v55, %v994_v54  ;;  %v2246_v62 = vpack.c.bf16 %v999_v61, %v998_v60  ;;  %v1102_v55 = vld [vmem:[#allocation9 + $0xd0] sm:$0xff] }
 0x1ab   : > { %2207 = vmatprep.subr.bf16.mxu1 %v2206_v59  ;;  %v1106_v61 = vld [vmem:[#allocation9 + $0xf0] sm:$0xff] }
 0x1ac   : > { %2239 = vmatprep.subr.bf16.mxu0 %v2238_v56 }
 0x1ad   : > { %2241 = vmatpush3.bf16.msra.mxu0 %v2238_v56  ;;  %v1103_v56 = vld [vmem:[#allocation9 + $0xd8] sm:$0xff] }
 0x1ae   : > { %2209 = vmatpush3.bf16.msra.mxu1 %v2206_v59  ;;  %v2242_v59 = vpack.c.bf16 %v997_v58, %v996_v57  ;;  %v2286_v57 = vpack.c.bf16 %v1103_v56, %v1102_v55  ;;  %v1104_v58 = vld [vmem:[#allocation9 + $0xe0] sm:$0xff] }
 0x1af   : > { %2211 = vmatprep.subr.bf16.mxu1 %v2210_v63 }
 0x1b0   : > { %2243 = vmatprep.subr.bf16.mxu0 %v2242_v59 }
 0x1b1   : > { %2245 = vmatpush3.bf16.msra.mxu0 %v2242_v59  ;;  %v1105_v59 = vld [vmem:[#allocation9 + $0xe8] sm:$0xff] }
 0x1b2   : > { %2213 = vmatpush3.bf16.msra.mxu1 %v2210_v63  ;;  %2247 = vmatprep.subr.bf16.mxu0 %v2246_v62  ;;  %v1000_v63 = vld [vmem:[#allocation9 + $0x40] sm:$0xff]  ;;  %v2290_v60 = vpack.c.bf16 %v1105_v59, %v1104_v58 }
 0x1b3   : > { %2215 = vmatprep.subr.bf16.mxu1 %v2214_v3  ;;  %v2250_v2 = vpack.c.bf16 %v1001_v1, %v1000_v63  ;;  %v1188_v1 = vld [vmem:[#allocation9 + $0x100] sm:$0xff] }
 0x1b5   : > { %2249 = vmatpush3.bf16.msra.mxu0 %v2246_v62  ;;  %v1107_v62 = vld [vmem:[#allocation9 + $0xf8] sm:$0xff] }
 0x1b6   : > { %2217 = vmatpush3.bf16.msra.mxu1 %v2214_v3  ;;  %2251 = vmatprep.subr.bf16.mxu0 %v2250_v2  ;;  %v1003_v3 = vld [vmem:[#allocation9 + $0x58] sm:$0xff]  ;;  %v2294_v63 = vpack.c.bf16 %v1107_v62, %v1106_v61 }
 0x1b7   : > { %2219 = vmatprep.subr.bf16.mxu1 %v2218_v6 }
 0x1b9   : > { %2253 = vmatpush3.bf16.msra.mxu0 %v2250_v2  ;;  %v1189_v2 = vld [vmem:[#allocation9 + $0x108] sm:$0xff] }
 0x1ba   : > { %2221 = vmatpush3.bf16.msra.mxu1 %v2218_v6  ;;  %v1005_v6 = vld [vmem:[#allocation9 + $0x68] sm:$0xff] }
 0x1bb   : > { %2223 = vmatprep.subr.bf16.mxu1 %v2222_v9  ;;  %v2258_v7 = vpack.c.bf16 %v1005_v6, %v1004_v5  ;;  %v1192_v6 = vld [vmem:[#allocation9 + $0x120] sm:$0xff] }
 0x1be   : > { %2225 = vmatpush3.bf16.msra.mxu1 %v2222_v9  ;;  %v1007_v9 = vld [vmem:[#allocation9 + $0x78] sm:$0xff] }
 0x1bf   : > { %2227 = vmatprep.subr.bf16.mxu1 %v2226_v15  ;;  %v2262_v13 = vpack.c.bf16 %v1007_v9, %v1006_v8 }
 0x1c2   : > { %2229 = vmatpush3.bf16.msra.mxu1 %v2226_v15  ;;  %v1093_v15 = vld [vmem:[#allocation9 + $0x88] sm:$0xff] }
 0x1c3   : > { %2231 = vmatprep.subr.bf16.mxu1 %v2230_v18  ;;  %v2266_v16 = vpack.c.bf16 %v1093_v15, %v1092_v14  ;;  %v1195_v14 = vld [vmem:[#allocation9 + $0x138] sm:$0xff] }
 0x1c6   : > { %2233 = vmatpush3.bf16.msra.mxu1 %v2230_v18  ;;  %v780_v18 = vsub.s32 1, %v2856_v10 }
 0x1c7   : > { %2330 = vmatprep.subr.bf16.mxu1 %v2627_v22 }
 0x1c8   : > { %v781_v19 = vrot.slane %v2862_v12, %v780_v18 }
 0x1c9   : > { %1943 = vmatmul.mubr.f32.vlgmr.msra.gmra.mrb[0].mxu1 %v881_v25 }
 0x1ca   : > { %2332 = vmatpush3.bf16.msra.mxu1 %v2331_v21  ;;  %2082 = vmatprep.mubr.msk.f32.mxu1 %vm2628_vm4, %v2626_v0 }
 0x1cb   : > { %2333 = vmatprep.subr.bf16.mxu1 %v2627_v22 }
 0x1ce   : > { %2335 = vmatpush3.bf16.msra.mxu1 %v2334_v26 }
 0x1cf   : > { %2336 = vmatprep.subr.bf16.mxu1 %v2627_v22 }
 0x1d2   : > { %2338 = vmatpush3.bf16.msra.mxu1 %v2337_v31 }
 0x1d3   : > { %2339 = vmatprep.subr.bf16.mxu1 %v2627_v22 }
 0x1d6   : > { %2341 = vmatpush3.bf16.msra.mxu1 %v2340_v35 }
 0x1d7   : > { %2342 = vmatprep.subr.bf16.mxu1 %v2627_v22 }
 0x1da   : > { %2344 = vmatpush3.bf16.msra.mxu1 %v2343_v39 }
 0x1db   : > { %2345 = vmatprep.subr.bf16.mxu1 %v2627_v22 }
 0x1de   : > { %2347 = vmatpush3.bf16.msra.mxu1 %v2346_v43  ;;  %v1097_v43 = vld [vmem:[#allocation9 + $0xa8] sm:$0xff] }
 0x1df   : > { %2348 = vmatprep.subr.bf16.mxu1 %v2627_v22 }
 0x1e2   : > { %2350 = vmatpush3.bf16.msra.mxu1 %v2349_v47  ;;  %v2274_v47 = vpack.c.bf16 %v1097_v43, %v1096_v42 }
 0x1e3   : > { %2351 = vmatprep.subr.bf16.mxu1 %v2627_v22 }
 0x1e6   : > { %2353 = vmatpush3.bf16.msra.mxu1 %v2352_v51  ;;  %v2278_v51 = vpack.c.bf16 %v1099_v49, %v1098_v48 }
 0x1e7   : > { %2085 = vmatprep.subr.mxu1 %v2626_v0 }
 0x1e9   : > { %2083 = vmatmul.mubr.f32.vlgmr.msra.gmra.mrb[2].mxu1 %v1287_v53  ;;  %v1101_v53 = vld [vmem:[#allocation9 + $0xc8] sm:$0xff] }
 0x1ea   : > { %2087 = vmatprep.mubr.msk.f32.mxu1 %vm2628_vm4, %v2626_v0  ;;  %v1002_v0 = vld [vmem:[#allocation9 + $0x50] sm:$0xff]  ;;  %2086 = vmatpush3.msk.msra.mxu1 %vm1382_vm5, %v1376_v17  ;;  %v2282_v54 = vpack.c.bf16 %v1101_v53, %v1100_v52  ;;  %v1197_v17 = vld [vmem:[#allocation9 + $0x148] sm:$0xff] }
 0x1eb   : > { %v2254_v4 = vpack.c.bf16 %v1003_v3, %v1002_v0  ;;  %v2298_v0 = vpack.c.bf16 %v1189_v2, %v1188_v1  ;;  %v1190_v3 = vld [vmem:[#allocation9 + $0x110] sm:$0xff] }
 0x1ed   : > { %2255 = vmatprep.subr.bf16.mxu0 %v2254_v4 }
 0x1ee   : > { %2257 = vmatpush3.bf16.msra.mxu0 %v2254_v4  ;;  %v1191_v4 = vld [vmem:[#allocation9 + $0x118] sm:$0xff] }
 0x1ef   : > { %2259 = vmatprep.subr.bf16.mxu0 %v2258_v7  ;;  %v2302_v5 = vpack.c.bf16 %v1191_v4, %v1190_v3 }
 0x1f2   : > { %2261 = vmatpush3.bf16.msra.mxu0 %v2258_v7  ;;  %v1193_v7 = vld [vmem:[#allocation9 + $0x128] sm:$0xff] }
 0x1f3   : > { %2263 = vmatprep.subr.bf16.mxu0 %v2262_v13  ;;  %v2306_v9 = vpack.c.bf16 %v1193_v7, %v1192_v6 }
 0x1f6   : > { %2265 = vmatpush3.bf16.msra.mxu0 %v2262_v13  ;;  %v1194_v13 = vld [vmem:[#allocation9 + $0x130] sm:$0xff] }
 0x1f7   : > { %2267 = vmatprep.subr.bf16.mxu0 %v2266_v16  ;;  %v2310_v15 = vpack.c.bf16 %v1195_v14, %v1194_v13 }
 0x29c   : > { %v1944_v20 = vpop.f32.mrb[0].mxu1 }
 0x29d   : > { %v2356_v21 = vadd.f32 %v1944_v20, %v781_v19  ;;  %v965_v22 = vpop.f32.mrb[1].mxu1  ;;  %v1199_v20 = vld [vmem:[#allocation9 + $0x158] sm:$0xff] }
 0x29e   : > { %v2357_v23 = vadd.f32 %v965_v22, %v781_v19  ;;  %v1198_v19 = vld [vmem:[#allocation9 + $0x150] sm:$0xff]  ;;  %v1200_v22 = vld [vmem:[#allocation9 + $0x160] sm:$0xff] }
 0x29f   : > { %v979_v24 = vmin.f32 %v2356_v21, 0.0  ;;  %vm977_vm6 = vcmp.gt.f32.partialorder %v2356_v21, 0.0 }
 0x2a0   : > { %v978_v25 = vmin.f32 %v2357_v23, 0.0  ;;  %vm976_vm7 = vcmp.gt.f32.partialorder %v2357_v23, 0.0 }
 0x2a1   : > { %v982_v26 = vmul.f32 1.442695, %v979_v24 }
 0x2a2   : > { %v980_v27 = vmul.f32 1.442695, %v978_v25  ;;  %v1202_v25 = vld [vmem:[#allocation9 + $0x170] sm:$0xff] }
 0x2a3   : > { %2453 = vpow2.f32 %v982_v26  ;;  %v1203_v26 = vld [vmem:[#allocation9 + $0x178] sm:$0xff] }
 0x2a4   : > { %2455 = vpow2.f32 %v980_v27  ;;  %v2326_v27 = vpack.c.bf16 %v1203_v26, %v1202_v25 }
 0x2ad   : > { %v2454_v28 = vpop.eup %2453 }
 0x2ae   : > { %v2456_v31 = vpop.eup %2455  ;;  %v1613_v32 = vadd.f32 -1.0, %v2454_v28 }
 0x2af   : > { %v1612_v33 = vadd.f32 -1.0, %v2456_v31 }
 0x2b0   : > { %v987_v34 = vsel %vm977_vm6, %v2356_v21, %v1613_v32  ;;  %v2318_v21 = vpack.c.bf16 %v1199_v20, %v1198_v19 }
 0x2b1   : > { %989 = vst [vmem:[#allocation3 + $0x9] sm:$0xff] %v987_v34  ;;  %v986_v35 = vsel %vm976_vm7, %v2357_v23, %v1612_v33  ;;  %v1201_v23 = vld [vmem:[#allocation9 + $0x168] sm:$0xff]  ;;  %v1377_v33 = vld [vmem:[%s3005_s8] sm:$0x1] }
 0x2b2   : > { %988 = vst [vmem:[#allocation3 + $0x1] sm:$0xff] %v986_v35  ;;  %v2322_v24 = vpack.c.bf16 %v1201_v23, %v1200_v22 }
 0x2b8   : > { %v1186_v28 = vld [vmem:[#allocation3 + $0xa] sm:$0xff] }
 0x2b9   : > { %v990_v38 = vld [vmem:[#allocation3] sm:$0xff]  ;;  %v991_v39 = vld [vmem:[#allocation3 + $0x8] sm:$0xff] }
 0x2ba   : > { %1977 = vmatprep.mubr.f32.mxu0 %v990_v38  ;;  %v1185_v8 = vld [vmem:[#allocation3 + $0x2] sm:$0xff]  ;;  %v1085_v38 = vsub.s32 2, %v2856_v10 }
 0x2bb   : > { %1978 = vmatmul.mubr.f32.vlgmr.msra.gmra.mrb[2].mxu0 %v991_v39 }
 0x2bc   : > { %2269 = vmatpush3.bf16.msra.mxu0 %v2266_v16  ;;  %2012 = vmatprep.mubr.f32.mxu0 %v986_v35  ;;  %v1371_v44 = vpop.f32.mrb[2].mxu1  ;;  %v1196_v16 = vld [vmem:[#allocation9 + $0x140] sm:$0xff] }
 0x2bd   : > { %v1372_v45 = vadd.f32 %v1371_v44, %v1304_v41  ;;  %v2084_v46 = vpop.f32.mrb[3].mxu1  ;;  %2271 = vmatprep.subr.bf16.mxu0 %v2270_v40  ;;  %v2314_v18 = vpack.c.bf16 %v1197_v17, %v1196_v16 }
 0x2bf   : > { %v1375_v50 = vmax.f32 %v1372_v45, 0.0 }
 0x2c0   : > { %2273 = vmatpush3.bf16.msra.mxu0 %v2270_v40  ;;  %v1086_v40 = vrot.slane %v2862_v12, %v1085_v38 }
 0x2c1   : > { %2088 = vmatmul.mubr.msk.f32.vlgmr.msra.gmra.mrb[4].mxu1 %vm1378_vm8, %v1375_v50  ;;  %2275 = vmatprep.subr.bf16.mxu0 %v2274_v47 }
 0x2c4   : > { %2277 = vmatpush3.bf16.msra.mxu0 %v2274_v47 }
 0x2c5   : > { %2279 = vmatprep.subr.bf16.mxu0 %v2278_v51 }
 0x2c8   : > { %2281 = vmatpush3.bf16.msra.mxu0 %v2278_v51 }
 0x2c9   : > { %2283 = vmatprep.subr.bf16.mxu0 %v2282_v54 }
 0x2cc   : > { %2285 = vmatpush3.bf16.msra.mxu0 %v2282_v54 }
 0x2cd   : > { %2287 = vmatprep.subr.bf16.mxu0 %v2286_v57 }
 0x2d0   : > { %2289 = vmatpush3.bf16.msra.mxu0 %v2286_v57 }
 0x2d1   : > { %2291 = vmatprep.subr.bf16.mxu0 %v2290_v60 }
 0x2d4   : > { %2293 = vmatpush3.bf16.msra.mxu0 %v2290_v60 }
 0x2d5   : > { %2295 = vmatprep.subr.bf16.mxu0 %v2294_v63 }
 0x2d8   : > { %2297 = vmatpush3.bf16.msra.mxu0 %v2294_v63 }
 0x2d9   : > { %2299 = vmatprep.subr.bf16.mxu0 %v2298_v0 }
 0x2db   : > { %2013 = vmatmul.mubr.f32.vlgmr.msra.gmra.mrb[2].mxu0 %v987_v34 }
 0x2dc   : > { %2301 = vmatpush3.bf16.msra.mxu0 %v2298_v0  ;;  %2047 = vmatprep.mubr.f32.mxu0 %v1185_v8 }
 0x2dd   : > { %2303 = vmatprep.subr.bf16.mxu0 %v2302_v5 }
 0x2e0   : > { %2305 = vmatpush3.bf16.msra.mxu0 %v2302_v5 }
 0x2e1   : > { %2307 = vmatprep.subr.bf16.mxu0 %v2306_v9 }
 0x2e4   : > { %2309 = vmatpush3.bf16.msra.mxu0 %v2306_v9 }
 0x2e5   : > { %2311 = vmatprep.subr.bf16.mxu0 %v2310_v15 }
 0x2e8   : > { %2313 = vmatpush3.bf16.msra.mxu0 %v2310_v15 }
 0x2e9   : > { %2315 = vmatprep.subr.bf16.mxu0 %v2314_v18 }
 0x2ec   : > { %2317 = vmatpush3.bf16.msra.mxu0 %v2314_v18 }
 0x2ed   : > { %2319 = vmatprep.subr.bf16.mxu0 %v2318_v21 }
 0x2f0   : > { %2321 = vmatpush3.bf16.msra.mxu0 %v2318_v21 }
 0x2f1   : > { %2323 = vmatprep.subr.bf16.mxu0 %v2322_v24 }
 0x2f4   : > { %2325 = vmatpush3.bf16.msra.mxu0 %v2322_v24 }
 0x2f5   : > { %2327 = vmatprep.subr.bf16.mxu0 %v2326_v27 }
 0x2f8   : > { %2329 = vmatpush3.bf16.msra.mxu0 %v2326_v27 }
 0x2fb   : > { %2048 = vmatmul.mubr.f32.vlgmr.msra.gmra.mrb[2].mxu0 %v1186_v28 }
 0x394   : > { %v1452_v31 = vpop.f32.mrb[4].mxu1 }
 0x395   : > { %v2089_v32 = vpop.f32.mrb[5].mxu1  ;;  %v1453_v34 = vadd.f32 %v1452_v31, %v1377_v33 }
 0x397   : > { %v1616_v35 = vmul.f32 -1.442695, %v1453_v34 }
 0x399   : > { %2457 = vpow2.f32 %v1616_v35 }
 0x3a3   : > { %v2458_v36 = vpop.eup %2457 }
 0x3a4   : > { %v1459_v37 = vadd.f32 1.0, %v2458_v36 }
 0x3a6   : > { %2459 = vrcp.f32 %v1459_v37 }
 0x3b0   : > { %v2460_v39 = vpop.eup %2459 }
 0x3b1   : > { %v1465_v41 = vrot.slane %v2460_v39, %v479_v11 }
 0x3b3   : > { %v1467_v44 = vmul.f32 %v1465_v41, %v2867_v29  ;;  %v1466_v47 = vmul.f32 %v1465_v41, %v2870_v30 }
 0x3ce   : > { %v2049_v42 = vpop.f32.mrb[2].mxu0 }
 0x3cf   : > { %v2358_v43 = vadd.f32 %v2049_v42, %v1086_v40  ;;  %v1270_v45 = vpop.f32.mrb[3].mxu0 }
 0x3d0   : > { %v2359_v46 = vadd.f32 %v1270_v45, %v1086_v40 }
 0x3d1   : > { %v1469_v48 = vadd.f32 %v2358_v43, %v1467_v44 }
 0x3d2   : > { %v1468_v49 = vadd.f32 %v2359_v46, %v1466_v47 }
 0x3d3   : > { %v1473_v50 = vmin.f32 %v1469_v48, 0.0  ;;  %vm1471_vm9 = vcmp.gt.f32.partialorder %v1469_v48, 0.0 }
 0x3d4   : > { %v1472_v51 = vmin.f32 %v1468_v49, 0.0  ;;  %vm1470_vm10 = vcmp.gt.f32.partialorder %v1468_v49, 0.0 }
 0x3d5   : > { %v1476_v52 = vmul.f32 1.442695, %v1473_v50 }
 0x3d6   : > { %v1474_v53 = vmul.f32 1.442695, %v1472_v51 }
 0x3d7   : > { %2461 = vpow2.f32 %v1476_v52 }
 0x3d8   : > { %2463 = vpow2.f32 %v1474_v53 }
 0x3e1   : > { %v2462_v10 = vpop.eup %2461 }
 0x3e2   : > { %v2464_v11 = vpop.eup %2463  ;;  %v1618_v12 = vadd.f32 -1.0, %v2462_v10 }
 0x3e3   : > { %v1617_v29 = vadd.f32 -1.0, %v2464_v11 }
 0x3e4   : > { %v1481_v30 = vsel %vm1471_vm9, %v1469_v48, %v1618_v12 }
 0x3e5   : > { %1483 = vst [vmem:[%s369_s29 + $0x8] sm:$0xff] %v1481_v30  ;;  %v1480_v54 = vsel %vm1470_vm10, %v1468_v49, %v1617_v29 }
 0x3e6   : > { %1482 = vst [vmem:[%s369_s29] sm:$0xff] %v1480_v54 }
 0x3e7   : > { %2562 = shalt.err (!%p2559_p9)
}
 0x3e8   : > { %s2563_s11 = scalar_lea.hbm %s2954_s21, 256  ;;  %s2567_s17 = scalar_lea.hbm %s3006_s9, 512 }
 0x3e9   : > { %p2564_p2 = scmp.ne.s32.totalorder %s2954_s21, %s2563_s11  ;;  %p2568_p5 = scmp.lt.u32.totalorder %s2954_s21, %s3006_s9 }
 0x3ea   : > { %p2569_p10 = scmp.lt.u32.totalorder %s2567_s17, %s2563_s11  ;;  %p2571_p12 = scmp.lt.u32.totalorder %s2563_s11, %s2954_s21 }
 0x3eb   : > { %p2565_p0 = pnand %p2564_p2, %p3030_p7 }
 0x3ec   : > { %p2570_p4 = por %p2569_p10, %p2568_p5 }
 0x3ed   : > { %p2566_p3 = pneg %p2565_p0 }
 0x3ee   : > { %p2572_p8 = por %p2571_p12, %p2570_p4 }
 0x3f0   : > { %p2573_p11 = pnand %p2572_p8, %p2566_p3 }
 0x3f2   : > { %2576 = shalt.err (!%p2573_p11)
}
 0x3f3   : > { %s2630_s27 = smov 128   ;;  %s2631_s29 = smov 8  }
 0x3f4   : > { %2384 = dma.vmem_to_hbm [thread:$0]  (%p3030_p7), %s2949_s23, 256, %s2954_s21, %s2956_s13, %s2630_s27, %s2630_s27, %s2631_s29  }
 0x3f5 PF: > { %s3031_s26 = sld [smem:[#allocation14_spill]]  ;;  %s3032_s30 = sld [smem:[#allocation18_spill]] }
 0x3f6   : > { %p2406_p13 = scmp.ge.s32.totalorder %s2619_s12, 2 }
 0x3fb   : > { %s1513_s18 = sand.u32 1, %s3031_s26   ;;  %p3033_p1 = scmp.ne.s32.totalorder %s3032_s30, 0 }
 0x3fc   : > { %s1514_s24 = scalar_lea.sflag [#allocation6], %s1513_s18 }
 0x3fd   : > { %p2397_p6 = pnand %p2406_p13, %p3033_p1 }
 0x3ff   : > { %2602 = dma.done.wait (!%p2397_p6), %s1514_s24, 256  }
 0x400   : > { %2604 = vsyncadd (!%p2397_p6), %s1514_s24, 4294967040  ;;  %s3034_s12 = sld [smem:[#allocation16_spill]]  ;;  %s3035_s28 = sld [smem:[#allocation15_spill]] }
 0x401   : > { %s3036_s11 = sld [smem:[#allocation17_spill]]  ;;  %s3037_s30 = smov %s2611_s10 }
 0x406   : > { %p21_p9 = scmp.ge.s32.totalorder %s3034_s12, 4   ;;  %s3038_s10 = smov %s3035_s28 }
 0x408   :  { %23 = sbr.rel (!%p21_p9) target bundleno = 5 (0x5), region = 110 }
 0x40f   :  { %1519 = vsyncpa [#allocation5], 1 }
 0x410   :  { %1521 = vsyncpa [#allocation5 + $0x1], 1 }
 0x411   :  { %1522 = vsyncpa [#allocation8], 1 }
 0x412   :  { %1523 = vsyncpa [#allocation6], 1 }
 0x413   :  { %1525 = vsyncpa [#allocation6 + $0x1], 1 }

</bundles_post_ra>
